<compile_context>
chip_gen: v7x
topology: tpu7x:2x2x1
jax: 0.10.0
libtpu: 0.0.40
codegen_flags: <defaults>
</compile_context>

<pallas_src>
import functools
import math

import jax
import jax.numpy as jnp
from jax import lax
from jax.experimental import pallas as pl
from jax.experimental.pallas import tpu as pltpu


# ----------------------------------------------------------------------------
# helpers
# ----------------------------------------------------------------------------
def _round_up(x, m):
    return (x + m - 1) // m * m


def _pad2(x, rows, cols, dtype):
    r, c = x.shape
    x = x.astype(dtype)
    if r == rows and c == cols:
        return x
    return jnp.zeros((rows, cols), dtype).at[:r, :c].set(x)


def l2_normalize(x, eps=1e-12):
    # torch.nn.functional.normalize(x, dim=1): x / max(||x||_2, eps)
    ss = jnp.sum(x * x, axis=1, keepdims=True)
    return x * lax.rsqrt(jnp.maximum(ss, eps * eps))


def plan_spmm_tiles(n, tm_req, tk_req):
    """Clamp requested tiles to the 128-padded problem, then pad the problem up
    to a common multiple of the tiles (pad-to-tile, never shrink-to-fit)."""
    base = _round_up(n, 128)
    tm = min(_round_up(tm_req, 128), base)
    tk = min(_round_up(tk_req, 128), base)
    np_ = _round_up(n, math.lcm(tm, tk))
    return np_, tm, tk


def prepare_adj(adj, np_):
    """Pad + cast the (static) dense normalized adjacency ONCE, outside the
    per-step forward, so the N^2 f32->bf16 conversion is not repaid per call."""
    return _pad2(adj, np_, np_, jnp.bfloat16)


# ----------------------------------------------------------------------------
# Kernel 1: one LightGCN propagation layer, fused with the running layer sum
#   adj: [Np, Np] bf16, x: [Np, D] bf16, sum_in: [Np, D] f32
#   nxt = (adj @ x) as bf16 (next-layer input); sum_out = sum_in + adj @ x
# ----------------------------------------------------------------------------
def _spmm_layer_kernel(adj_ref, x_ref, sum_ref, nxt_ref, sumo_ref, acc_ref, *,
                       x_resident, tk):
    k = pl.program_id(1)

    @pl.when(k == 0)
    def _():
        acc_ref[...] = jnp.zeros_like(acc_ref)

    if x_resident:   # x stays in VMEM for the whole grid; slice the k-chunk
        start = pl.multiple_of(k * tk, 128)
        xblk = x_ref[pl.ds(start, tk), :]
    else:
        xblk = x_ref[...]

    acc_ref[...] += jnp.dot(adj_ref[...], xblk,
                            preferred_element_type=jnp.float32)

    @pl.when(k == pl.num_programs(1) - 1)
    def _():
        acc = acc_ref[...]
        nxt_ref[...] = acc.astype(nxt_ref.dtype)      # fused bf16 recast
        sumo_ref[...] = sum_ref[...] + acc            # fused layer-sum epilogue


def spmm_layer(adj_p, x_bf16, sum_f32, *, tm, tk, x_resident):
    Np = adj_p.shape[0]
    D = x_bf16.shape[1]
    grid = (Np // tm, Np // tk)
    if x_resident:
        x_spec = pl.BlockSpec((Np, D), lambda i, k: (0, 0))   # DMA'd once
    else:
        x_spec = pl.BlockSpec((tk, D), lambda i, k: (k, 0))
    kernel = functools.partial(_spmm_layer_kernel, x_resident=x_resident, tk=tk)
    return pl.pallas_call(
        kernel,
        out_shape=(jax.ShapeDtypeStruct((Np, D), jnp.bfloat16),
                   jax.ShapeDtypeStruct((Np, D), jnp.float32)),
        grid_spec=pltpu.PrefetchScalarGridSpec(
            num_scalar_prefetch=0,
            grid=grid,
            in_specs=[
                pl.BlockSpec((tm, tk), lambda i, k: (i, k)),
                x_spec,
                pl.BlockSpec((tm, D), lambda i, k: (i, 0)),
            ],
            out_specs=[
                pl.BlockSpec((tm, D), lambda i, k: (i, 0)),
                pl.BlockSpec((tm, D), lambda i, k: (i, 0)),
            ],
            scratch_shapes=[pltpu.VMEM((tm, D), jnp.float32)],
        ),
        compiler_params=pltpu.CompilerParams(
            dimension_semantics=("parallel", "arbitrary")),
    )(adj_p, x_bf16, sum_f32)


# x kept fully VMEM-resident when its footprint is small (double-buffer safe).
_X_RESIDENT_BYTES = 4 * 1024 * 1024


def gcn_propagate(adj_p, ego, n_layers, *, tm, tk):
    """mean over [ego, A@ego, A@(A@ego), ...]; bf16 MXU operands, f32 layer sum.
    The per-layer f32 sum and the bf16 recast are fused into the SpMM kernel."""
    N, D = ego.shape
    Np = adj_p.shape[0]
    assert Np % tm == 0 and Np % tk == 0
    x_resident = (Np * D * 2) <= _X_RESIDENT_BYTES
    cur = _pad2(ego, Np, D, jnp.bfloat16)
    layer_sum = _pad2(ego, Np, D, jnp.float32)
    for _ in range(n_layers):        # layer loop must stay outside the tiling
        cur, layer_sum = spmm_layer(adj_p, cur, layer_sum,
                                    tm=tm, tk=tk, x_resident=x_resident)
    return layer_sum[:N] / jnp.float32(n_layers + 1)


# ----------------------------------------------------------------------------
# Kernel 2: fused IGCL auto-encoder over the full [N, D] matrix, tiled over rows
#   recon = fc2(fc1(x)); per-tile lane-dense partial loss; output = normalize(recon)
# ----------------------------------------------------------------------------
def _ae_kernel(x_ref, w1_ref, b1_ref, w2_ref, b2_ref, recon_ref, loss_ref, *,
               rows_total, masked):
    i = pl.program_id(0)
    x = x_ref[...]                                        # f32 [tm, D]
    z = jnp.dot(x.astype(jnp.bfloat16), w1_ref[...],
                preferred_element_type=jnp.float32) + b1_ref[...]
    recon = jnp.dot(z.astype(jnp.bfloat16), w2_ref[...],
                    preferred_element_type=jnp.float32) + b2_ref[...]

    diff = recon - x
    if masked:  # zero padded-row loss contributions; (tm,1) compare broadcasts
        tm = x.shape[0]
        row = lax.broadcasted_iota(jnp.int32, (tm, 1), 0) + i * tm
        diff = diff * (row < rows_total).astype(jnp.float32)

    # per-tile, per-lane partial loss -> dense (1,1,D) store; wrapper sums all.
    loss_ref[...] = jnp.sum(diff * diff, axis=0, keepdims=True)[None]

    # fused F.normalize(recon, dim=1) epilogue (rsqrt on EUP instead of sqrt+div)
    ss = jnp.sum(recon * recon, axis=1, keepdims=True)
    recon_ref[...] = recon * lax.rsqrt(jnp.maximum(ss, 1e-24))


def igcl_autoencoder(x, w1, b1, w2, b2, *, tm=512):
    M, D = x.shape
    R = w1.shape[0]
    tm = min(_round_up(tm, 128), _round_up(M, 128))
    Mp = _round_up(M, tm)
    n_tiles = Mp // tm
    x_p = _pad2(x, Mp, D, jnp.float32)
    w1t = w1.T.astype(jnp.bfloat16)            # [D, R]
    w2t = w2.T.astype(jnp.bfloat16)            # [R, D]
    b1r = b1.reshape(1, R).astype(jnp.float32)
    b2r = b2.reshape(1, D).astype(jnp.float32)
    kernel = functools.partial(_ae_kernel, rows_total=M, masked=(Mp != M))
    recon_norm, loss_parts = pl.pallas_call(
        kernel,
        out_shape=(jax.ShapeDtypeStruct((Mp, D), jnp.float32),
                   jax.ShapeDtypeStruct((n_tiles, 1, D), jnp.float32)),
        grid_spec=pltpu.PrefetchScalarGridSpec(
            num_scalar_prefetch=0,
            grid=(n_tiles,),
            in_specs=[
                pl.BlockSpec((tm, D), lambda i: (i, 0)),
                pl.BlockSpec((D, R), lambda i: (0, 0)),   # weights stay resident
                pl.BlockSpec((1, R), lambda i: (0, 0)),
                pl.BlockSpec((R, D), lambda i: (0, 0)),
                pl.BlockSpec((1, D), lambda i: (0, 0)),
            ],
            out_specs=[
                pl.BlockSpec((tm, D), lambda i: (i, 0)),
                pl.BlockSpec((1, 1, D), lambda i: (i, 0, 0)),  # per-tile partials
            ],
        ),
        compiler_params=pltpu.CompilerParams(
            dimension_semantics=("parallel",)),    # no resident state -> megacore OK
    )(x_p, w1t, b1r, w2t, b2r)
    return recon_norm[:M], jnp.sum(loss_parts)


# ----------------------------------------------------------------------------
# Kernel 3: SSL logits, tiled over gen rows (lane-dense output tiles)
#   ssl = a1 @ gen^T - rowdot(a1, a2)[:, None]   (pos hoisted to the wrapper)
# ----------------------------------------------------------------------------
def _ssl_kernel(a1_ref, pos_ref, genT_ref, out_ref):
    tot = jnp.dot(a1_ref[...], genT_ref[...], preferred_element_type=jnp.float32)
    out_ref[...] = tot - pos_ref[...]


def ssl_logits_fn(a1, a2, gen, *, tn=1024):
    """a1, a2: [B, D] (normalized lookups); gen: [Ng, D] normalized gen embeds."""
    B, D = a1.shape
    Ng = gen.shape[0]
    tn = min(_round_up(tn, 128), _round_up(Ng, 128))
    Np = _round_up(Ng, tn)
    pos = jnp.sum(a1 * a2, axis=-1, keepdims=True)        # hoisted row-dot, f32
    genT = _pad2(gen.T, D, Np, jnp.bfloat16)              # wrapper-side transpose
    a1b = a1.astype(jnp.bfloat16)
    out = pl.pallas_call(
        _ssl_kernel,
        out_shape=jax.ShapeDtypeStruct((B, Np), jnp.float32),
        grid_spec=pltpu.PrefetchScalarGridSpec(
            num_scalar_prefetch=0,
            grid=(Np // tn,),
            in_specs=[
                pl.BlockSpec((B, D), lambda j: (0, 0)),
                pl.BlockSpec((B, 1), lambda j: (0, 0)),
                pl.BlockSpec((D, tn), lambda j: (0, j)),
            ],
            out_specs=pl.BlockSpec((B, tn), lambda j: (0, j)),
        ),
        compiler_params=pltpu.CompilerParams(
            dimension_semantics=("parallel",)),
    )(a1b, pos, genT)
    return out[:, :Ng]


# ----------------------------------------------------------------------------
# Full forward pass (mirrors _LightGCN.forward)
# ----------------------------------------------------------------------------
def lightgcn_forward(params, norm_adj_p, pd_graph_p, users, items, neg_items, *, cfg):
    num_users = cfg["num_users"]
    gcn_tm, gcn_tk = cfg["gcn_tm"], cfg["gcn_tk"]
    ae_tm, ssl_tn = cfg["ae_tm"], cfg["ssl_tn"]

    # ---- _forward_gcn(norm_adj): LightGCN propagation over base embeddings
    ego = jnp.concatenate([params["user_emb"], params["item_emb"]], axis=0)
    all_emb = gcn_propagate(norm_adj_p, ego, cfg["n_layers"], tm=gcn_tm, tk=gcn_tk)
    user_embeddings = all_emb[:num_users]
    item_embeddings = all_emb[num_users:]

    # ---- IGCL: gcn over pd_graph (ego = concat(user, item) == all_emb), then
    #      one fused encode/decode over all rows (same fc1/fc2 for users+items);
    #      recon_loss == loss_user + loss_item, gen output is already normalized.
    all2 = gcn_propagate(pd_graph_p, all_emb, cfg["IGCL_layers"], tm=gcn_tm, tk=gcn_tk)
    gen_norm_all, recon_loss = igcl_autoencoder(
        all2, params["fc1_w"], params["fc1_b"], params["fc2_w"], params["fc2_b"],
        tm=ae_tm)
    user_gen_norm = gen_norm_all[:num_users]
    item_gen_norm = gen_norm_all[num_users:]

    # ---- normalization of propagated embeddings (O(N*D) elementwise, plain JAX)
    user_embeddings1 = l2_normalize(user_embeddings)
    item_embeddings1 = l2_normalize(item_embeddings)

    # ---- embedding lookups (glue)
    user_embs = user_embeddings[users]
    item_embs = item_embeddings[items]
    neg_item_embs = item_embeddings[neg_items]
    user_embs1 = user_embeddings1[users]
    item_embs1 = item_embeddings1[items]
    user_embs2 = user_gen_norm[users]
    item_embs2 = item_gen_norm[items]

    # ---- sup logits: trivial VPU work, XLA fuses it with the gathers for free
    sup_logits = (jnp.sum(user_embs * item_embs, axis=-1)
                  - jnp.sum(user_embs * neg_item_embs, axis=-1))

    # ---- SSL logits (tiled Pallas kernels)
    ssl_logits_user = ssl_logits_fn(user_embs1, user_embs2, user_gen_norm, tn=ssl_tn)
    ssl_logits_item = ssl_logits_fn(item_embs1, item_embs2, item_gen_norm, tn=ssl_tn)

    return sup_logits, ssl_logits_user, ssl_logits_item, recon_loss


# ----------------------------------------------------------------------------
# Pure-JAX f32 reference (mirrors the torch module) for a tolerance check
# ----------------------------------------------------------------------------
def reference_forward(params, cfg, norm_adj, pd_graph, users, items, neg_items):
    nu = cfg["num_users"]

    def prop(adj, ego, layers):
        acc, cur = ego, ego
        for _ in range(layers):
            cur = adj @ cur
            acc = acc + cur
        return acc / (layers + 1)

    ego = jnp.concatenate([params["user_emb"], params["item_emb"]], axis=0)
    all_emb = prop(norm_adj, ego, cfg["n_layers"])
    u_emb, i_emb = all_emb[:nu], all_emb[nu:]
    all2 = prop(pd_graph, all_emb, cfg["IGCL_layers"])
    z = all2 @ params["fc1_w"].T + params["fc1_b"]
    recon = z @ params["fc2_w"].T + params["fc2_b"]
    recon_loss = jnp.sum((recon - all2) ** 2)
    gen = l2_normalize(recon)
    u1, i1 = l2_normalize(u_emb), l2_normalize(i_emb)
    ug, ig = gen[:nu], gen[nu:]
    ue, ie, ne = u_emb[users], i_emb[items], i_emb[neg_items]
    sup = jnp.sum(ue * ie, -1) - jnp.sum(ue * ne, -1)
    ssl_u = u1[users] @ ug.T - jnp.sum(u1[users] * ug[users], -1, keepdims=True)
    ssl_i = i1[items] @ ig.T - jnp.sum(i1[items] * ig[items], -1, keepdims=True)
    return sup, ssl_u, ssl_i, recon_loss


# ----------------------------------------------------------------------------
# Driver
# ----------------------------------------------------------------------------
if __name__ == "__main__":
    # Small graph, but shaped so the test exercises multi-tile grids, the
    # k-accumulation path, and the masked last AE tile (N=240 -> padded 256).
    # Production-scale tile choices: gcn_tm=512..1024, gcn_tk=1024..4096,
    # ae_tm=512..1024, ssl_tn=1024..2048 (raise vmem_limit_bytes on v6e/v7x).
    num_users = 100
    num_items = 140
    embed_dim = 128       # lane-dense (128) MXU output width
    recon_dim = 64
    n_layers = 2
    IGCL_layers = 2
    batch = 8
    N = num_users + num_items

    Np, gcn_tm, gcn_tk = plan_spmm_tiles(N, 128, 128)   # -> Np=256, grid (2,2)
    cfg = dict(num_users=num_users, num_items=num_items,
               n_layers=n_layers, IGCL_layers=IGCL_layers,
               gcn_tm=gcn_tm, gcn_tk=gcn_tk, ae_tm=128, ssl_tn=128)

    key = jax.random.PRNGKey(0)
    k = jax.random.split(key, 8)

    # deterministic parameters (shapes follow the torch __init__)
    params = {
        "user_emb": jax.random.normal(k[0], (num_users, embed_dim), jnp.float32) * 0.1,
        "item_emb": jax.random.normal(k[1], (num_items, embed_dim), jnp.float32) * 0.1,
        # nn.Linear(embed_dim, recon_dim): weight [recon_dim, embed_dim]
        "fc1_w": jax.random.normal(k[2], (recon_dim, embed_dim), jnp.float32)
                 * (1.0 / jnp.sqrt(embed_dim)),
        "fc1_b": jax.random.normal(k[3], (recon_dim,), jnp.float32) * 0.01,
        # nn.Linear(recon_dim, embed_dim): weight [embed_dim, recon_dim]
        "fc2_w": jax.random.normal(k[4], (embed_dim, recon_dim), jnp.float32)
                 * (1.0 / jnp.sqrt(recon_dim)),
        "fc2_b": jax.random.normal(k[5], (embed_dim,), jnp.float32) * 0.01,
    }

    # dense "normalized adjacency" matrices (torch sparse mm == dense matmul here)
    def make_norm_adj(seed_key):
        a = (jax.random.uniform(seed_key, (N, N)) < 0.2).astype(jnp.float32)
        a = a + a.T + jnp.eye(N, dtype=jnp.float32)
        deg = jnp.sum(a, axis=1, keepdims=True)
        dinv = 1.0 / jnp.sqrt(jnp.maximum(deg, 1.0))
        return dinv * a * dinv.T        # degree normalization kept in f32

    norm_adj = make_norm_adj(k[6])
    pd_graph = make_norm_adj(jax.random.fold_in(k[6], 1))

    # static adjacencies: pad + cast to the MXU dtype ONCE, outside the forward
    norm_adj_p = prepare_adj(norm_adj, Np)
    pd_graph_p = prepare_adj(pd_graph, Np)

    users = jax.random.randint(k[7], (batch,), 0, num_users)
    items = jax.random.randint(jax.random.fold_in(k[7], 1), (batch,), 0, num_items)
    neg_items = jax.random.randint(jax.random.fold_in(k[7], 2), (batch,), 0, num_items)

    fwd = jax.jit(functools.partial(lightgcn_forward, cfg=cfg))
    sup_logits, ssl_u, ssl_i, recon_loss = fwd(
        params, norm_adj_p, pd_graph_p, users, items, neg_items)
    jax.block_until_ready((sup_logits, ssl_u, ssl_i, recon_loss))

    assert sup_logits.shape == (batch,)
    assert ssl_u.shape == (batch, num_users)
    assert ssl_i.shape == (batch, num_items)
    assert recon_loss.shape == ()
    assert bool(jnp.all(jnp.isfinite(sup_logits)))
    assert bool(jnp.all(jnp.isfinite(ssl_u)))
    assert bool(jnp.all(jnp.isfinite(ssl_i)))
    assert bool(jnp.isfinite(recon_loss))

    # correctness vs f32 reference (bf16 MXU operands -> loose tolerances)
    ref = reference_forward(params, cfg, norm_adj, pd_graph, users, items, neg_items)
    names = ("sup_logits", "ssl_u", "ssl_i", "recon_loss")
    for name, got, want in zip(names, (sup_logits, ssl_u, ssl_i, recon_loss), ref):
        ok = bool(jnp.allclose(got, want, rtol=0.15, atol=0.15))
        assert ok, (name, float(jnp.max(jnp.abs(got - want))))

    print("KERNEL_OK")
</pallas_src>

<mosaic_0001>
module attributes {stable_mosaic.version = 11 : i64} {
  func.func @_spmm_layer_kernel(%arg0: i32, %arg1: i32, %arg2: memref<128x128xbf16, #tpu.memory_space<vmem>>, %arg3: memref<256x128xbf16, #tpu.memory_space<vmem>>, %arg4: memref<128x128xf32, #tpu.memory_space<vmem>>, %arg5: memref<128x128xbf16, #tpu.memory_space<vmem>>, %arg6: memref<128x128xf32, #tpu.memory_space<vmem>>, %arg7: memref<128x128xf32, #tpu.memory_space<vmem>>) attributes {dimension_semantics = [#tpu.dimension_semantics<parallel>, #tpu.dimension_semantics<arbitrary>], iteration_bounds = array<i64: 2, 2>, scalar_prefetch = 0 : i64, scratch_operands = 1 : i64, tpu.core_type = #tpu.core_type<tc>, window_params = [{transform_indices = @transform_0, window_bounds = array<i64: 128, 128>}, {pipeline_mode = #tpu.pipeline_mode<synchronous>, transform_indices = @transform_1, window_bounds = array<i64: 256, 128>}, {transform_indices = @transform_2, window_bounds = array<i64: 128, 128>}, {transform_indices = @transform_3, window_bounds = array<i64: 128, 128>}, {transform_indices = @transform_4, window_bounds = array<i64: 128, 128>}]} {
    %c0_i32 = arith.constant 0 : i32
    %0 = arith.cmpi eq, %arg1, %c0_i32 : i32
    %1 = arith.extui %0 : i1 to i32
    %c0_i32_0 = arith.constant 0 : i32
    %2 = arith.cmpi ne, %1, %c0_i32_0 : i32
    scf.if %2 {
      %cst_8 = arith.constant 0.000000e+00 : f32
      %15 = vector.broadcast %cst_8 : f32 to vector<128x128xf32>
      %c0_9 = arith.constant 0 : index
      %c0_10 = arith.constant 0 : index
      %16 = vector.load %arg7[%c0_9, %c0_10] : memref<128x128xf32, #tpu.memory_space<vmem>>, vector<128x128xf32>
      tpu.vector_store %arg7[%c0_9, %c0_10], %15 {strides = array<i32>} : memref<128x128xf32, #tpu.memory_space<vmem>>, vector<128x128xf32>,
    } else {
    }
    %c128_i32 = arith.constant 128 : i32
    %3 = arith.muli %arg1, %c128_i32 : i32
    %4 = tpu.assume_multiple %3, 128 : i32
    %5 = arith.index_cast %4 : i32 to index
    %c0 = arith.constant 0 : index
    %6 = vector.load %arg3[%5, %c0] : memref<256x128xbf16, #tpu.memory_space<vmem>>, vector<128x128xbf16>
    %c0_1 = arith.constant 0 : index
    %c0_2 = arith.constant 0 : index
    %7 = vector.load %arg7[%c0_1, %c0_2] : memref<128x128xf32, #tpu.memory_space<vmem>>, vector<128x128xf32>
    %c0_3 = arith.constant 0 : index
    %c0_4 = arith.constant 0 : index
    %8 = vector.load %arg2[%c0_3, %c0_4] : memref<128x128xbf16, #tpu.memory_space<vmem>>, vector<128x128xbf16>
    %cst = arith.constant dense<0.000000e+00> : vector<128x128xf32>
    %9 = tpu.matmul %8, %6, %cst {dimension_numbers = #tpu.dot_dimension_numbers<[1], [0], [0], [1], [0, 0, 1, 1], [], []>} : vector<128x128xbf16>, vector<128x128xbf16>, vector<128x128xf32> -> vector<128x128xf32>
    %10 = arith.addf %7, %9 : vector<128x128xf32>
    %c0_5 = arith.constant 0 : index
    %c0_6 = arith.constant 0 : index
    %11 = vector.load %arg7[%c0_5, %c0_6] : memref<128x128xf32, #tpu.memory_space<vmem>>, vector<128x128xf32>
    tpu.vector_store %arg7[%c0_5, %c0_6], %10 {strides = array<i32>} : memref<128x128xf32, #tpu.memory_space<vmem>>, vector<128x128xf32>,
    %c1_i32 = arith.constant 1 : i32
    %12 = arith.cmpi eq, %arg1, %c1_i32 : i32
    %13 = arith.extui %12 : i1 to i32
    %c0_i32_7 = arith.constant 0 : i32
    %14 = arith.cmpi ne, %13, %c0_i32_7 : i32
    scf.if %14 {
      %c0_8 = arith.constant 0 : index
      %c0_9 = arith.constant 0 : index
      %15 = vector.load %arg7[%c0_8, %c0_9] : memref<128x128xf32, #tpu.memory_space<vmem>>, vector<128x128xf32>
      %16 = arith.truncf %15 : vector<128x128xf32> to vector<128x128xbf16>
      %c0_10 = arith.constant 0 : index
      %c0_11 = arith.constant 0 : index
      %17 = vector.load %arg5[%c0_10, %c0_11] : memref<128x128xbf16, #tpu.memory_space<vmem>>, vector<128x128xbf16>
      tpu.vector_store %arg5[%c0_10, %c0_11], %16 {strides = array<i32>} : memref<128x128xbf16, #tpu.memory_space<vmem>>, vector<128x128xbf16>,
      %c0_12 = arith.constant 0 : index
      %c0_13 = arith.constant 0 : index
      %18 = vector.load %arg4[%c0_12, %c0_13] : memref<128x128xf32, #tpu.memory_space<vmem>>, vector<128x128xf32>
      %19 = arith.addf %18, %15 : vector<128x128xf32>
      %c0_14 = arith.constant 0 : index
      %c0_15 = arith.constant 0 : index
      %20 = vector.load %arg6[%c0_14, %c0_15] : memref<128x128xf32, #tpu.memory_space<vmem>>, vector<128x128xf32>
      tpu.vector_store %arg6[%c0_14, %c0_15], %19 {strides = array<i32>} : memref<128x128xf32, #tpu.memory_space<vmem>>, vector<128x128xf32>,
    } else {
    }
    return
  }
  func.func @transform_0(%arg0: i32, %arg1: i32) -> (i32, i32) {
    %c0_i32 = arith.constant 0 : i32
    return %arg0, %arg1 : i32, i32
  }
  func.func @transform_1(%arg0: i32, %arg1: i32) -> (i32, i32) {
    %c0_i32 = arith.constant 0 : i32
    %c0_i32_0 = arith.constant 0 : i32
    %c0_i32_1 = arith.constant 0 : i32
    return %c0_i32, %c0_i32_0 : i32, i32
  }
  func.func @transform_2(%arg0: i32, %arg1: i32) -> (i32, i32) {
    %c0_i32 = arith.constant 0 : i32
    %c0_i32_0 = arith.constant 0 : i32
    return %arg0, %c0_i32 : i32, i32
  }
  func.func @transform_3(%arg0: i32, %arg1: i32) -> (i32, i32) {
    %c0_i32 = arith.constant 0 : i32
    %c0_i32_0 = arith.constant 0 : i32
    return %arg0, %c0_i32 : i32, i32
  }
  func.func @transform_4(%arg0: i32, %arg1: i32) -> (i32, i32) {
    %c0_i32 = arith.constant 0 : i32
    %c0_i32_0 = arith.constant 0 : i32
    return %arg0, %c0_i32 : i32, i32
  }
}

module attributes {stable_mosaic.version = 11 : i64} {
  func.func @_spmm_layer_kernel(%arg0: i32, %arg1: i32, %arg2: memref<128x128xbf16, #tpu.memory_space<vmem>>, %arg3: memref<256x128xbf16, #tpu.memory_space<vmem>>, %arg4: memref<128x128xf32, #tpu.memory_space<vmem>>, %arg5: memref<128x128xbf16, #tpu.memory_space<vmem>>, %arg6: memref<128x128xf32, #tpu.memory_space<vmem>>, %arg7: memref<128x128xf32, #tpu.memory_space<vmem>>) attributes {dimension_semantics = [#tpu.dimension_semantics<parallel>, #tpu.dimension_semantics<arbitrary>], iteration_bounds = array<i64: 2, 2>, scalar_prefetch = 0 : i64, scratch_operands = 1 : i64, tpu.core_type = #tpu.core_type<tc>, window_params = [{transform_indices = @transform_0, window_bounds = array<i64: 128, 128>}, {pipeline_mode = #tpu.pipeline_mode<synchronous>, transform_indices = @transform_1, window_bounds = array<i64: 256, 128>}, {transform_indices = @transform_2, window_bounds = array<i64: 128, 128>}, {transform_indices = @transform_3, window_bounds = array<i64: 128, 128>}, {transform_indices = @transform_4, window_bounds = array<i64: 128, 128>}]} {
    %c0_i32 = arith.constant 0 : i32
    %0 = arith.cmpi eq, %arg1, %c0_i32 : i32
    %1 = arith.extui %0 : i1 to i32
    %c0_i32_0 = arith.constant 0 : i32
    %2 = arith.cmpi ne, %1, %c0_i32_0 : i32
    scf.if %2 {
      %cst_8 = arith.constant 0.000000e+00 : f32
      %15 = vector.broadcast %cst_8 : f32 to vector<128x128xf32>
      %c0_9 = arith.constant 0 : index
      %c0_10 = arith.constant 0 : index
      %16 = vector.load %arg7[%c0_9, %c0_10] : memref<128x128xf32, #tpu.memory_space<vmem>>, vector<128x128xf32>
      tpu.vector_store %arg7[%c0_9, %c0_10], %15 {strides = array<i32>} : memref<128x128xf32, #tpu.memory_space<vmem>>, vector<128x128xf32>,
    } else {
    }
    %c128_i32 = arith.constant 128 : i32
    %3 = arith.muli %arg1, %c128_i32 : i32
    %4 = tpu.assume_multiple %3, 128 : i32
    %5 = arith.index_cast %4 : i32 to index
    %c0 = arith.constant 0 : index
    %6 = vector.load %arg3[%5, %c0] : memref<256x128xbf16, #tpu.memory_space<vmem>>, vector<128x128xbf16>
    %c0_1 = arith.constant 0 : index
    %c0_2 = arith.constant 0 : index
    %7 = vector.load %arg7[%c0_1, %c0_2] : memref<128x128xf32, #tpu.memory_space<vmem>>, vector<128x128xf32>
    %c0_3 = arith.constant 0 : index
    %c0_4 = arith.constant 0 : index
    %8 = vector.load %arg2[%c0_3, %c0_4] : memref<128x128xbf16, #tpu.memory_space<vmem>>, vector<128x128xbf16>
    %cst = arith.constant dense<0.000000e+00> : vector<128x128xf32>
    %9 = tpu.matmul %8, %6, %cst {dimension_numbers = #tpu.dot_dimension_numbers<[1], [0], [0], [1], [0, 0, 1, 1], [], []>} : vector<128x128xbf16>, vector<128x128xbf16>, vector<128x128xf32> -> vector<128x128xf32>
    %10 = arith.addf %7, %9 : vector<128x128xf32>
    %c0_5 = arith.constant 0 : index
    %c0_6 = arith.constant 0 : index
    %11 = vector.load %arg7[%c0_5, %c0_6] : memref<128x128xf32, #tpu.memory_space<vmem>>, vector<128x128xf32>
    tpu.vector_store %arg7[%c0_5, %c0_6], %10 {strides = array<i32>} : memref<128x128xf32, #tpu.memory_space<vmem>>, vector<128x128xf32>,
    %c1_i32 = arith.constant 1 : i32
    %12 = arith.cmpi eq, %arg1, %c1_i32 : i32
    %13 = arith.extui %12 : i1 to i32
    %c0_i32_7 = arith.constant 0 : i32
    %14 = arith.cmpi ne, %13, %c0_i32_7 : i32
    scf.if %14 {
      %c0_8 = arith.constant 0 : index
      %c0_9 = arith.constant 0 : index
      %15 = vector.load %arg7[%c0_8, %c0_9] : memref<128x128xf32, #tpu.memory_space<vmem>>, vector<128x128xf32>
      %16 = arith.truncf %15 : vector<128x128xf32> to vector<128x128xbf16>
      %c0_10 = arith.constant 0 : index
      %c0_11 = arith.constant 0 : index
      %17 = vector.load %arg5[%c0_10, %c0_11] : memref<128x128xbf16, #tpu.memory_space<vmem>>, vector<128x128xbf16>
      tpu.vector_store %arg5[%c0_10, %c0_11], %16 {strides = array<i32>} : memref<128x128xbf16, #tpu.memory_space<vmem>>, vector<128x128xbf16>,
      %c0_12 = arith.constant 0 : index
      %c0_13 = arith.constant 0 : index
      %18 = vector.load %arg4[%c0_12, %c0_13] : memref<128x128xf32, #tpu.memory_space<vmem>>, vector<128x128xf32>
      %19 = arith.addf %18, %15 : vector<128x128xf32>
      %c0_14 = arith.constant 0 : index
      %c0_15 = arith.constant 0 : index
      %20 = vector.load %arg6[%c0_14, %c0_15] : memref<128x128xf32, #tpu.memory_space<vmem>>, vector<128x128xf32>
      tpu.vector_store %arg6[%c0_14, %c0_15], %19 {strides = array<i32>} : memref<128x128xf32, #tpu.memory_space<vmem>>, vector<128x128xf32>,
    } else {
    }
    return
  }
  func.func @transform_0(%arg0: i32, %arg1: i32) -> (i32, i32) {
    %c0_i32 = arith.constant 0 : i32
    return %arg0, %arg1 : i32, i32
  }
  func.func @transform_1(%arg0: i32, %arg1: i32) -> (i32, i32) {
    %c0_i32 = arith.constant 0 : i32
    %c0_i32_0 = arith.constant 0 : i32
    %c0_i32_1 = arith.constant 0 : i32
    return %c0_i32, %c0_i32_0 : i32, i32
  }
  func.func @transform_2(%arg0: i32, %arg1: i32) -> (i32, i32) {
    %c0_i32 = arith.constant 0 : i32
    %c0_i32_0 = arith.constant 0 : i32
    return %arg0, %c0_i32 : i32, i32
  }
  func.func @transform_3(%arg0: i32, %arg1: i32) -> (i32, i32) {
    %c0_i32 = arith.constant 0 : i32
    %c0_i32_0 = arith.constant 0 : i32
    return %arg0, %c0_i32 : i32, i32
  }
  func.func @transform_4(%arg0: i32, %arg1: i32) -> (i32, i32) {
    %c0_i32 = arith.constant 0 : i32
    %c0_i32_0 = arith.constant 0 : i32
    return %arg0, %c0_i32 : i32, i32
  }
}

module attributes {stable_mosaic.version = 11 : i64} {
  func.func @_ae_kernel(%arg0: i32, %arg1: memref<128x128xf32, #tpu.memory_space<vmem>>, %arg2: memref<128x64xbf16, #tpu.memory_space<vmem>>, %arg3: memref<1x64xf32, #tpu.memory_space<vmem>>, %arg4: memref<64x128xbf16, #tpu.memory_space<vmem>>, %arg5: memref<1x128xf32, #tpu.memory_space<vmem>>, %arg6: memref<128x128xf32, #tpu.memory_space<vmem>>, %arg7: memref<1x1x128xf32, #tpu.memory_space<vmem>>) attributes {dimension_semantics = [#tpu.dimension_semantics<parallel>], iteration_bounds = array<i64: 2>, scalar_prefetch = 0 : i64, scratch_operands = 0 : i64, tpu.core_type = #tpu.core_type<tc>, window_params = [{transform_indices = @transform_0, window_bounds = array<i64: 128, 128>}, {pipeline_mode = #tpu.pipeline_mode<synchronous>, transform_indices = @transform_1, window_bounds = array<i64: 128, 64>}, {pipeline_mode = #tpu.pipeline_mode<synchronous>, transform_indices = @transform_2, window_bounds = array<i64: 1, 64>}, {pipeline_mode = #tpu.pipeline_mode<synchronous>, transform_indices = @transform_3, window_bounds = array<i64: 64, 128>}, {pipeline_mode = #tpu.pipeline_mode<synchronous>, transform_indices = @transform_4, window_bounds = array<i64: 1, 128>}, {transform_indices = @transform_5, window_bounds = array<i64: 128, 128>}, {transform_indices = @transform_6, window_bounds = array<i64: 1, 1, 128>}]} {
    %c0 = arith.constant 0 : index
    %c0_0 = arith.constant 0 : index
    %0 = vector.load %arg1[%c0, %c0_0] : memref<128x128xf32, #tpu.memory_space<vmem>>, vector<128x128xf32>
    %1 = arith.truncf %0 : vector<128x128xf32> to vector<128x128xbf16>
    %c0_1 = arith.constant 0 : index
    %c0_2 = arith.constant 0 : index
    %2 = vector.load %arg2[%c0_1, %c0_2] : memref<128x64xbf16, #tpu.memory_space<vmem>>, vector<128x64xbf16>
    %cst = arith.constant dense<0.000000e+00> : vector<128x64xf32>
    %3 = tpu.matmul %1, %2, %cst {dimension_numbers = #tpu.dot_dimension_numbers<[1], [0], [0], [1], [0, 0, 1, 1], [], []>} : vector<128x128xbf16>, vector<128x64xbf16>, vector<128x64xf32> -> vector<128x64xf32>
    %c0_3 = arith.constant 0 : index
    %c0_4 = arith.constant 0 : index
    %4 = vector.load %arg3[%c0_3, %c0_4] : memref<1x64xf32, #tpu.memory_space<vmem>>, vector<1x64xf32>
    %5 = vector.broadcast %4 : vector<1x64xf32> to vector<128x64xf32>
    %6 = arith.addf %3, %5 : vector<128x64xf32>
    %7 = arith.truncf %6 : vector<128x64xf32> to vector<128x64xbf16>
    %c0_5 = arith.constant 0 : index
    %c0_6 = arith.constant 0 : index
    %8 = vector.load %arg4[%c0_5, %c0_6] : memref<64x128xbf16, #tpu.memory_space<vmem>>, vector<64x128xbf16>
    %cst_7 = arith.constant dense<0.000000e+00> : vector<128x128xf32>
    %9 = tpu.matmul %7, %8, %cst_7 {dimension_numbers = #tpu.dot_dimension_numbers<[1], [0], [0], [1], [0, 0, 1, 1], [], []>} : vector<128x64xbf16>, vector<64x128xbf16>, vector<128x128xf32> -> vector<128x128xf32>
    %c0_8 = arith.constant 0 : index
    %c0_9 = arith.constant 0 : index
    %10 = vector.load %arg5[%c0_8, %c0_9] : memref<1x128xf32, #tpu.memory_space<vmem>>, vector<1x128xf32>
    %11 = vector.broadcast %10 : vector<1x128xf32> to vector<128x128xf32>
    %12 = arith.addf %9, %11 : vector<128x128xf32>
    %13 = arith.subf %12, %0 : vector<128x128xf32>
    %14 = tpu.iota {dimensions = array<i32: 0>} : vector<128x1xi32>
    %c128_i32 = arith.constant 128 : i32
    %15 = arith.muli %arg0, %c128_i32 : i32
    %16 = vector.broadcast %15 : i32 to vector<128x1xi32>
    %17 = arith.addi %14, %16 : vector<128x1xi32>
    %c240_i32 = arith.constant 240 : i32
    %18 = vector.broadcast %c240_i32 : i32 to vector<128x1xi32>
    %19 = arith.cmpi slt, %17, %18 : vector<128x1xi32>
    %20 = arith.extui %19 : vector<128x1xi1> to vector<128x1xi32>
    %21 = arith.sitofp %20 : vector<128x1xi32> to vector<128x1xf32>
    %22 = vector.broadcast %21 : vector<128x1xf32> to vector<128x128xf32>
    %23 = arith.mulf %13, %22 : vector<128x128xf32>
    %24 = arith.mulf %23, %23 : vector<128x128xf32>
    %cst_10 = arith.constant dense<0.000000e+00> : vector<128xf32>
    %25 = vector.multi_reduction <add>, %24, %cst_10 [0] : vector<128x128xf32> to vector<128xf32>
    %26 = vector.shape_cast %25 : vector<128xf32> to vector<1x128xf32>
    %27 = vector.shape_cast %26 : vector<1x128xf32> to vector<1x1x128xf32>
    %c0_11 = arith.constant 0 : index
    %c0_12 = arith.constant 0 : index
    %c0_13 = arith.constant 0 : index
    %28 = vector.load %arg7[%c0_11, %c0_12, %c0_13] : memref<1x1x128xf32, #tpu.memory_space<vmem>>, vector<1x1x128xf32>
    tpu.vector_store %arg7[%c0_11, %c0_12, %c0_13], %27 {strides = array<i32>} : memref<1x1x128xf32, #tpu.memory_space<vmem>>, vector<1x1x128xf32>,
    %29 = arith.mulf %12, %12 : vector<128x128xf32>
    %cst_14 = arith.constant dense<0.000000e+00> : vector<128xf32>
    %30 = vector.multi_reduction <add>, %29, %cst_14 [1] : vector<128x128xf32> to vector<128xf32>
    %31 = vector.shape_cast %30 : vector<128xf32> to vector<128x1xf32>
    %cst_15 = arith.constant 1.000000e-24 : f32
    %32 = vector.broadcast %cst_15 : f32 to vector<128x1xf32>
    %33 = arith.maximumf %31, %32 : vector<128x1xf32>
    %34 = math.rsqrt %33 : vector<128x1xf32>
    %35 = vector.broadcast %34 : vector<128x1xf32> to vector<128x128xf32>
    %36 = arith.mulf %12, %35 : vector<128x128xf32>
    %c0_16 = arith.constant 0 : index
    %c0_17 = arith.constant 0 : index
    %37 = vector.load %arg6[%c0_16, %c0_17] : memref<128x128xf32, #tpu.memory_space<vmem>>, vector<128x128xf32>
    tpu.vector_store %arg6[%c0_16, %c0_17], %36 {strides = array<i32>} : memref<128x128xf32, #tpu.memory_space<vmem>>, vector<128x128xf32>,
    return
  }
  func.func @transform_0(%arg0: i32) -> (i32, i32) {
    %c0_i32 = arith.constant 0 : i32
    %c0_i32_0 = arith.constant 0 : i32
    return %arg0, %c0_i32 : i32, i32
  }
  func.func @transform_1(%arg0: i32) -> (i32, i32) {
    %c0_i32 = arith.constant 0 : i32
    %c0_i32_0 = arith.constant 0 : i32
    %c0_i32_1 = arith.constant 0 : i32
    return %c0_i32, %c0_i32_0 : i32, i32
  }
  func.func @transform_2(%arg0: i32) -> (i32, i32) {
    %c0_i32 = arith.constant 0 : i32
    %c0_i32_0 = arith.constant 0 : i32
    %c0_i32_1 = arith.constant 0 : i32
    return %c0_i32, %c0_i32_0 : i32, i32
  }
  func.func @transform_3(%arg0: i32) -> (i32, i32) {
    %c0_i32 = arith.constant 0 : i32
    %c0_i32_0 = arith.constant 0 : i32
    %c0_i32_1 = arith.constant 0 : i32
    return %c0_i32, %c0_i32_0 : i32, i32
  }
  func.func @transform_4(%arg0: i32) -> (i32, i32) {
    %c0_i32 = arith.constant 0 : i32
    %c0_i32_0 = arith.constant 0 : i32
    %c0_i32_1 = arith.constant 0 : i32
    return %c0_i32, %c0_i32_0 : i32, i32
  }
  func.func @transform_5(%arg0: i32) -> (i32, i32) {
    %c0_i32 = arith.constant 0 : i32
    %c0_i32_0 = arith.constant 0 : i32
    return %arg0, %c0_i32 : i32, i32
  }
  func.func @transform_6(%arg0: i32) -> (i32, i32, i32) {
    %c0_i32 = arith.constant 0 : i32
    %c0_i32_0 = arith.constant 0 : i32
    %c0_i32_1 = arith.constant 0 : i32
    return %arg0, %c0_i32, %c0_i32_0 : i32, i32, i32
  }
}

module attributes {stable_mosaic.version = 11 : i64} {
  func.func @_ssl_kernel(%arg0: i32, %arg1: memref<8x128xbf16, #tpu.memory_space<vmem>>, %arg2: memref<8x1xf32, #tpu.memory_space<vmem>>, %arg3: memref<128x128xbf16, #tpu.memory_space<vmem>>, %arg4: memref<8x128xf32, #tpu.memory_space<vmem>>) attributes {dimension_semantics = [#tpu.dimension_semantics<parallel>], iteration_bounds = array<i64: 1>, scalar_prefetch = 0 : i64, scratch_operands = 0 : i64, tpu.core_type = #tpu.core_type<tc>, window_params = [{pipeline_mode = #tpu.pipeline_mode<synchronous>, transform_indices = @transform_0, window_bounds = array<i64: 8, 128>}, {pipeline_mode = #tpu.pipeline_mode<synchronous>, transform_indices = @transform_1, window_bounds = array<i64: 8, 1>}, {transform_indices = @transform_2, window_bounds = array<i64: 128, 128>}, {transform_indices = @transform_3, window_bounds = array<i64: 8, 128>}]} {
    %c0 = arith.constant 0 : index
    %c0_0 = arith.constant 0 : index
    %0 = vector.load %arg1[%c0, %c0_0] : memref<8x128xbf16, #tpu.memory_space<vmem>>, vector<8x128xbf16>
    %c0_1 = arith.constant 0 : index
    %c0_2 = arith.constant 0 : index
    %1 = vector.load %arg3[%c0_1, %c0_2] : memref<128x128xbf16, #tpu.memory_space<vmem>>, vector<128x128xbf16>
    %cst = arith.constant dense<0.000000e+00> : vector<8x128xf32>
    %2 = tpu.matmul %0, %1, %cst {dimension_numbers = #tpu.dot_dimension_numbers<[1], [0], [0], [1], [0, 0, 1, 1], [], []>} : vector<8x128xbf16>, vector<128x128xbf16>, vector<8x128xf32> -> vector<8x128xf32>
    %c0_3 = arith.constant 0 : index
    %c0_4 = arith.constant 0 : index
    %3 = vector.load %arg2[%c0_3, %c0_4] : memref<8x1xf32, #tpu.memory_space<vmem>>, vector<8x1xf32>
    %4 = vector.broadcast %3 : vector<8x1xf32> to vector<8x128xf32>
    %5 = arith.subf %2, %4 : vector<8x128xf32>
    %c0_5 = arith.constant 0 : index
    %c0_6 = arith.constant 0 : index
    %6 = vector.load %arg4[%c0_5, %c0_6] : memref<8x128xf32, #tpu.memory_space<vmem>>, vector<8x128xf32>
    tpu.vector_store %arg4[%c0_5, %c0_6], %5 {strides = array<i32>} : memref<8x128xf32, #tpu.memory_space<vmem>>, vector<8x128xf32>,
    return
  }
  func.func @transform_0(%arg0: i32) -> (i32, i32) {
    %c0_i32 = arith.constant 0 : i32
    %c0_i32_0 = arith.constant 0 : i32
    %c0_i32_1 = arith.constant 0 : i32
    return %c0_i32, %c0_i32_0 : i32, i32
  }
  func.func @transform_1(%arg0: i32) -> (i32, i32) {
    %c0_i32 = arith.constant 0 : i32
    %c0_i32_0 = arith.constant 0 : i32
    %c0_i32_1 = arith.constant 0 : i32
    return %c0_i32, %c0_i32_0 : i32, i32
  }
  func.func @transform_2(%arg0: i32) -> (i32, i32) {
    %c0_i32 = arith.constant 0 : i32
    %c0_i32_0 = arith.constant 0 : i32
    return %c0_i32, %arg0 : i32, i32
  }
  func.func @transform_3(%arg0: i32) -> (i32, i32) {
    %c0_i32 = arith.constant 0 : i32
    %c0_i32_0 = arith.constant 0 : i32
    return %c0_i32, %arg0 : i32, i32
  }
}

module attributes {stable_mosaic.version = 11 : i64} {
  func.func @_ssl_kernel(%arg0: i32, %arg1: memref<8x128xbf16, #tpu.memory_space<vmem>>, %arg2: memref<8x1xf32, #tpu.memory_space<vmem>>, %arg3: memref<128x128xbf16, #tpu.memory_space<vmem>>, %arg4: memref<8x128xf32, #tpu.memory_space<vmem>>) attributes {dimension_semantics = [#tpu.dimension_semantics<parallel>], iteration_bounds = array<i64: 2>, scalar_prefetch = 0 : i64, scratch_operands = 0 : i64, tpu.core_type = #tpu.core_type<tc>, window_params = [{pipeline_mode = #tpu.pipeline_mode<synchronous>, transform_indices = @transform_0, window_bounds = array<i64: 8, 128>}, {pipeline_mode = #tpu.pipeline_mode<synchronous>, transform_indices = @transform_1, window_bounds = array<i64: 8, 1>}, {transform_indices = @transform_2, window_bounds = array<i64: 128, 128>}, {transform_indices = @transform_3, window_bounds = array<i64: 8, 128>}]} {
    %c0 = arith.constant 0 : index
    %c0_0 = arith.constant 0 : index
    %0 = vector.load %arg1[%c0, %c0_0] : memref<8x128xbf16, #tpu.memory_space<vmem>>, vector<8x128xbf16>
    %c0_1 = arith.constant 0 : index
    %c0_2 = arith.constant 0 : index
    %1 = vector.load %arg3[%c0_1, %c0_2] : memref<128x128xbf16, #tpu.memory_space<vmem>>, vector<128x128xbf16>
    %cst = arith.constant dense<0.000000e+00> : vector<8x128xf32>
    %2 = tpu.matmul %0, %1, %cst {dimension_numbers = #tpu.dot_dimension_numbers<[1], [0], [0], [1], [0, 0, 1, 1], [], []>} : vector<8x128xbf16>, vector<128x128xbf16>, vector<8x128xf32> -> vector<8x128xf32>
    %c0_3 = arith.constant 0 : index
    %c0_4 = arith.constant 0 : index
    %3 = vector.load %arg2[%c0_3, %c0_4] : memref<8x1xf32, #tpu.memory_space<vmem>>, vector<8x1xf32>
    %4 = vector.broadcast %3 : vector<8x1xf32> to vector<8x128xf32>
    %5 = arith.subf %2, %4 : vector<8x128xf32>
    %c0_5 = arith.constant 0 : index
    %c0_6 = arith.constant 0 : index
    %6 = vector.load %arg4[%c0_5, %c0_6] : memref<8x128xf32, #tpu.memory_space<vmem>>, vector<8x128xf32>
    tpu.vector_store %arg4[%c0_5, %c0_6], %5 {strides = array<i32>} : memref<8x128xf32, #tpu.memory_space<vmem>>, vector<8x128xf32>,
    return
  }
  func.func @transform_0(%arg0: i32) -> (i32, i32) {
    %c0_i32 = arith.constant 0 : i32
    %c0_i32_0 = arith.constant 0 : i32
    %c0_i32_1 = arith.constant 0 : i32
    return %c0_i32, %c0_i32_0 : i32, i32
  }
  func.func @transform_1(%arg0: i32) -> (i32, i32) {
    %c0_i32 = arith.constant 0 : i32
    %c0_i32_0 = arith.constant 0 : i32
    %c0_i32_1 = arith.constant 0 : i32
    return %c0_i32, %c0_i32_0 : i32, i32
  }
  func.func @transform_2(%arg0: i32) -> (i32, i32) {
    %c0_i32 = arith.constant 0 : i32
    %c0_i32_0 = arith.constant 0 : i32
    return %c0_i32, %arg0 : i32, i32
  }
  func.func @transform_3(%arg0: i32) -> (i32, i32) {
    %c0_i32 = arith.constant 0 : i32
    %c0_i32_0 = arith.constant 0 : i32
    return %c0_i32, %arg0 : i32, i32
  }
}

</mosaic_0001>

<bundles_post_ra>
// kernel: sub.1
= control target key start
LH: loop header
LB: loop body
LE: loop exit
PB: predicated region body
PF: predicated region fallthrough
CT: control target
= control target key end

     0   :  { %3 = vsyncpa [#allocation1], 0  ;;  %s80_s0 = inlined_call_operand.vmem [shape: f32[8], index: 0, kind: input, shape index: {}]   ;;  %s81_s1 = inlined_call_operand.vmem [shape: f32[8], index: 1, kind: input, shape index: {}]   ;;  %s82_s2 = inlined_call_operand.hbm [shape: f32[8], index: 2, kind: output, shape index: {}]  }
   0x1   :  { %v4_v0 = vld [vmem:[%s80_s0] sm:$0x1] }
   0x2   :  { %v5_v1 = vld [vmem:[%s81_s1] sm:$0x1]  ;;  %s46_s1 = smov [#allocation0]  }
   0x3   :  { %v8_v2 = vsub.f32 %v4_v0, %v5_v1  ;;  %s15_s12 = sshll.u32 %s46_s1, 4  ;;  %s16_s12 = int_to_ptr.vmem [resolvable:$true] %s15_s12 }
   0x4   :  { %s22_s13 = scalar_lea.vmem %s16_s12, 16  ;;  %s26_s14 = scalar_lea.vmem %s16_s12, 32 }
   0x5   :  { %10 = vst [vmem:[#allocation0] sm:$0x1] %v8_v2  ;;  %p23_p0 = scmp.ne.s32.totalorder %s16_s12, %s22_s13  ;;  %p27_p1 = scmp.lt.s32.totalorder %s16_s12, %s16_s12 }
   0x6   :  { %p28_p2 = scmp.lt.s32.totalorder %s26_s14, %s22_s13 }
   0x8   :  { %p29_p3 = por %p28_p2, %p27_p1 }
   0xa   :  { %p30_p4 = pnand %p29_p3, %p23_p0 }
   0xc   :  { %33 = shalt.err (!%p30_p4)
}
   0xd   :  { %s34_s17 = scalar_lea.hbm %s82_s2, 16 }
   0xe   :  { %p35_p5 = scmp.ne.s32.totalorder %s82_s2, %s34_s17  ;;  %p38_p6 = scmp.lt.u32.totalorder %s34_s17, %s82_s2 }
  0x10   :  { %p40_p7 = pnand %p38_p6, %p35_p5 }
  0x12   :  { %43 = shalt.err (!%p40_p7)
}
  0x13   :  { %18 = dma.vmem_to_hbm [thread:$0]  %s16_s12, 16, %s82_s2, [#allocation1]  }
  0x14   :  { %44 = dma.done.wait [#allocation1], 16  }
  0x15   :  { %45 = vsyncadd [#allocation1], 4294967280 }
  0x16   :  { %20 = vsyncpa [#allocation1], 1 }

// kernel: lightgcn_forward.8
= control target key start
LH: loop header
LB: loop body
LE: loop exit
PB: predicated region body
PF: predicated region fallthrough
CT: control target
= control target key end

     0   :  { %s1645_s0 = inlined_call_operand.vmem [shape: bf16[256,256], index: 0, kind: input, shape index: {}]   ;;  %s1646_s1 = inlined_call_operand.vmem [shape: bf16[256,128], index: 1, kind: input, shape index: {}]   ;;  %s1647_s2 = inlined_call_operand.vmem [shape: f32[256,128], index: 2, kind: input, shape index: {}]   ;;  %s1648_s3 = inlined_call_operand.hbm [shape: bf16[256,128], index: 3, kind: output, shape index: {0}]   ;;  %s1649_s4 = inlined_call_operand.vmem [shape: f32[256,128], index: 4, kind: output, shape index: {1}]  }
   0x1   :  { %1652 = sst [smem:[#allocation9_spill]] %s1645_s0 }
   0x2   :  { %10 = vsyncpa [#allocation5], 0 }
   0x3   :  { %12 = vsyncpa [#allocation5 + $0x1], 0  ;;  %s1374_s15 = smov 0   ;;  %s1376_s16 = smov 0  }
   0x4   :  { %s1378_s17 = smov 0   ;;  %s1380_s18 = smov 0  }
   0x5   :  { %s1382_s19 = smov 0   ;;  %s1384_s20 = smov 0  }
   0x6   :  { %s1386_s21 = smov 0   ;;  %s1388_s22 = smov 0  }
   0x7   :  { %s1390_s23 = smov 0   ;;  %s1392_s24 = smov 0  }
   0x8 LB: > { %s942_s25 = sadd.s32 4294967295, %s1343_s24   ;;  %s943_s26 = sadd.s32 4294967294, %s1343_s24   ;;  %s1343_s24 = sphi %s1392_s24, %s18_s24   ;;  %s1339_s23 = sphi %s1390_s23, %s1669_s23   ;;  %s1335_s22 = sphi %s1388_s22, %s1668_s22   ;;  %s1331_s21 = sphi %s1386_s21, %s1667_s21   ;;  %s1327_s20 = sphi %s1384_s20, %s1666_s20   ;;  %s1323_s19 = sphi %s1382_s19, %s1665_s19   ;;  %s1319_s18 = sphi %s1380_s18, %s1664_s18   ;;  %s1315_s17 = sphi %s1378_s17, %s1663_s17   ;;  %s1311_s16 = sphi %s1376_s16, %s1662_s16   ;;  %s1307_s15 = sphi %s1374_s15, %s1661_s15  }
   0x9   : > { %s27_s27 = sadd.s32 1, %s1335_s22  ;;  %s30_s28 = sadd.s32 1, %s1339_s23 }
   0xa   : > { %p28_p0 = scmp.ge.s32.totalorder %s27_s27, 2  ;;  %s39_s29 = sadd.s32 1, %s1323_s19 }
   0xb   : > { %p46_p1 = scmp.ne.s32.totalorder %s1323_s19, %s1319_s18  ;;  %p47_p2 = scmp.eq.s32.totalorder %s1343_s24, 0 }
   0xc   : > { %s1671_s27 = smov (%p28_p0, %s27_s27), 0  ;;  %s1673_s28 = smov (!%p28_p0, %s30_s28), %s1339_s23 }
   0xd   : > { %1653 = sst [smem:[#allocation7_spill]] %s1671_s27  ;;  %s35_s30 = ssub.s32 %s1335_s22, %s1671_s27 }
   0xe   : > { %p1437_p3 = por %p47_p2, %p46_p1  ;;  %p32_p4 = scmp.ge.s32.totalorder %s1673_s28, 2 }
   0xf   : > { %s112_s6 = sadd.s32 1, %s1315_s17  ;;  %p122_p5 = scmp.ne.s32.totalorder %s1315_s17, %s1311_s16 }
  0x10   : > { %p123_p6 = scmp.eq.s32.totalorder %s942_s25, 3  ;;  %s1675_s28 = smov (%p32_p4, %s1673_s28), 0 }
  0x11   : > { %1655 = sst [smem:[#allocation8_spill]] %s1675_s28  ;;  %p128_p8 = scmp.ne.s32.totalorder %s1311_s16, %s1307_s15 }
  0x12   : > { %p1446_p7 = por %p123_p6, %p122_p5  ;;  %s34_s8 = ssub.s32 %s1339_s23, %s1675_s28 }
  0x13   : > { %p129_p9 = scmp.eq.s32.totalorder %s943_s26, 3  ;;  %s36_s9 = sor.u32 %s35_s30, %s34_s8 }
  0x14   : > { %p110_p10 = scmp.eq.s32.totalorder %s34_s8, 0  ;;  %p37_p11 = scmp.eq.s32.totalorder %s36_s9, 0 }
  0x15   : > { %p1454_p12 = por %p129_p9, %p128_p8  ;;  %p945_p13 = scmp.ge.s32.totalorder %s1343_s24, 4 }
  0x16   : > { %s1459_s11 = scalar_select %p110_p10, %s1315_s17, %s112_s6  }
  0x17   : > { %s1462_s12 = scalar_select %p37_p11, %s1323_s19, %s39_s29  }
  0x18   : > { %174 = sbr.rel (%p945_p13) target bundleno = 51 (0x33), region = 20 }
  0x1f   : > { %177 = sbr.rel (!%p1437_p3) target bundleno = 51 (0x33), region = 24  ;;  %s179_s13 = sand.u32 (%p1437_p3), 1, %s1323_s19  }
  0x20   : > { %s998_s14 = sshll.u32 (%p1437_p3), %s1339_s23, 5  ;;  %s946_s25 = sshll.u32 (%p1437_p3), %s179_s13, 6 }
  0x21   : > { %s184_s26 = sadd.s32 (%p1437_p3), %s1335_s22, %s998_s14  ;;  %s1658_s0 = sld [smem:[#allocation9_spill]] (%p1437_p3) }
  0x22   : > { %s949_s30 = sshll.u32 (%p1437_p3), %s184_s26, 2  ;;  %s181_s29 = scalar_lea.vmem (%p1437_p3), [#allocation3], %s946_s25 }
  0x27   : > { %s1473_s6 = scalar_lea.vmem %s1658_s0, %s949_s30 }
  0x28   : > { %v202_v0 = vld [vmem:[%s1473_s6] sm:$0xf]  ;;  %v204_v1 = vld [vmem:[%s1473_s6 + $0x8] sm:$0xf]  ;;  %v206_v2 = vld [vmem:[%s1473_s6 + $0x10] sm:$0xf] }
  0x29   : > { %203 = vst [vmem:[%s181_s29] sm:$0xf] %v202_v0  ;;  %205 = vst [vmem:[%s181_s29 + $0x4] sm:$0xf] %v204_v1  ;;  %v208_v3 = vld [vmem:[%s1473_s6 + $0x18] sm:$0xf] }
  0x2a   : > { %207 = vst [vmem:[%s181_s29 + $0x8] sm:$0xf] %v206_v2  ;;  %v210_v4 = vld [vmem:[%s1473_s6 + $0x20] sm:$0xf]  ;;  %v212_v5 = vld [vmem:[%s1473_s6 + $0x28] sm:$0xf] }
  0x2b   : > { %209 = vst [vmem:[%s181_s29 + $0xc] sm:$0xf] %v208_v3  ;;  %211 = vst [vmem:[%s181_s29 + $0x10] sm:$0xf] %v210_v4  ;;  %v214_v6 = vld [vmem:[%s1473_s6 + $0x30] sm:$0xf] }
  0x2c   : > { %213 = vst [vmem:[%s181_s29 + $0x14] sm:$0xf] %v212_v5  ;;  %v216_v7 = vld [vmem:[%s1473_s6 + $0x38] sm:$0xf]  ;;  %v218_v8 = vld [vmem:[%s1473_s6 + $0x40] sm:$0xf] }
  0x2d   : > { %215 = vst [vmem:[%s181_s29 + $0x18] sm:$0xf] %v214_v6  ;;  %217 = vst [vmem:[%s181_s29 + $0x1c] sm:$0xf] %v216_v7  ;;  %v220_v9 = vld [vmem:[%s1473_s6 + $0x48] sm:$0xf] }
  0x2e   : > { %219 = vst [vmem:[%s181_s29 + $0x20] sm:$0xf] %v218_v8  ;;  %v222_v10 = vld [vmem:[%s1473_s6 + $0x50] sm:$0xf]  ;;  %v224_v11 = vld [vmem:[%s1473_s6 + $0x58] sm:$0xf] }
  0x2f   : > { %221 = vst [vmem:[%s181_s29 + $0x24] sm:$0xf] %v220_v9  ;;  %223 = vst [vmem:[%s181_s29 + $0x28] sm:$0xf] %v222_v10  ;;  %v226_v12 = vld [vmem:[%s1473_s6 + $0x60] sm:$0xf] }
  0x30   : > { %225 = vst [vmem:[%s181_s29 + $0x2c] sm:$0xf] %v224_v11  ;;  %v228_v13 = vld [vmem:[%s1473_s6 + $0x68] sm:$0xf]  ;;  %v230_v14 = vld [vmem:[%s1473_s6 + $0x70] sm:$0xf] }
  0x31   : > { %227 = vst [vmem:[%s181_s29 + $0x30] sm:$0xf] %v226_v12  ;;  %229 = vst [vmem:[%s181_s29 + $0x34] sm:$0xf] %v228_v13  ;;  %v232_v15 = vld [vmem:[%s1473_s6 + $0x78] sm:$0xf] }
  0x32   : > { %231 = vst [vmem:[%s181_s29 + $0x38] sm:$0xf] %v230_v14  ;;  %233 = vst [vmem:[%s181_s29 + $0x3c] sm:$0xf] %v232_v15 }
  0x33 PF: > { %p950_p0 = scmp.ge.s32.totalorder %s1343_s24, 1  ;;  %p296_p1 = scmp.lt.s32.totalorder %s1343_s24, 5 }
  0x35   : > { %p297_p2 = pnand %p950_p0, %p296_p1 }
  0x36   : > { %s303_s5 = sand.u32 (!%p297_p2), 1, %s1319_s18   ;;  %s328_s13 = sand.u32 (!%p297_p2), 1, %s1311_s16  }
  0x37   : > { %300 = sbr.rel (%p297_p2) target bundleno = 373 (0x175), region = 69  ;;  %s951_s14 = sshll.u32 (!%p297_p2), %s303_s5, 6 }
  0x38   : > { %s952_s25 = sshll.u32 (!%p297_p2), %s328_s13, 6  ;;  %s953_s26 = sshll.u32 (!%p297_p2), %s1331_s21, 4 }
  0x39   : > { %p340_p3 = scmp.lt.s32.totalorder (!%p297_p2), %s953_s26, 31  ;;  %s1508_s27 = scalar_lea.vmem (!%p297_p2), [#allocation3], %s951_s14 }
  0x3a   : > { %s1510_s18 = scalar_lea.vmem (!%p297_p2), [#allocation4], %s952_s25  ;;  %p957_p4 = scmp.ne.s32.totalorder (!%p297_p2), %s1327_s20, 0 }
  0x3e   : > { %s1677_s26 = smov (!%p340_p3, %s953_s26), 31  ;;  %356 = sbr.rel (%p957_p4) target bundleno = 72 (0x48), region = 77 }
  0x3f   : > { %s954_s30 = sshll.u32 %s1677_s26, 3  ;;  %v1345_v16 = vmov (!%p957_p4), 0.0  }
  0x40   : > { %s1501_s6 = scalar_lea.vmem %s1647_s2, %s954_s30  ;;  %s1506_s28 = scalar_lea.vmem %s1649_s4, %s954_s30  ;;  %357 = vst [vmem:[#allocation2] sm:$0xff] (!%p957_p4), %v1345_v16  ;;  %358 = vst [vmem:[#allocation2 + $0x8] sm:$0xff] (!%p957_p4), %v1345_v16 }
  0x41   : > { %359 = vst [vmem:[#allocation2 + $0x10] sm:$0xff] (!%p957_p4), %v1345_v16  ;;  %360 = vst [vmem:[#allocation2 + $0x18] sm:$0xff] (!%p957_p4), %v1345_v16 }
  0x42   : > { %361 = vst [vmem:[#allocation2 + $0x20] sm:$0xff] (!%p957_p4), %v1345_v16  ;;  %362 = vst [vmem:[#allocation2 + $0x28] sm:$0xff] (!%p957_p4), %v1345_v16 }
  0x43   : > { %363 = vst [vmem:[#allocation2 + $0x30] sm:$0xff] (!%p957_p4), %v1345_v16  ;;  %364 = vst [vmem:[#allocation2 + $0x38] sm:$0xff] (!%p957_p4), %v1345_v16 }
  0x44   : > { %365 = vst [vmem:[#allocation2 + $0x40] sm:$0xff] (!%p957_p4), %v1345_v16  ;;  %366 = vst [vmem:[#allocation2 + $0x48] sm:$0xff] (!%p957_p4), %v1345_v16 }
  0x45   : > { %367 = vst [vmem:[#allocation2 + $0x50] sm:$0xff] %v1345_v16  ;;  %368 = vst [vmem:[#allocation2 + $0x58] sm:$0xff] %v1345_v16 }
  0x46   : > { %369 = vst [vmem:[#allocation2 + $0x60] sm:$0xff] %v1345_v16  ;;  %370 = vst [vmem:[#allocation2 + $0x68] sm:$0xff] %v1345_v16 }
  0x47   : > { %371 = vst [vmem:[#allocation2 + $0x70] sm:$0xff] %v1345_v16  ;;  %372 = vst [vmem:[#allocation2 + $0x78] sm:$0xff] %v1345_v16 }
  0x48 PF: > { %s958_s0 = sshll.u32 %s1327_s20, 7  ;;  %v1225_v17 = vld [vmem:[%s1508_s27] sm:$0xff]   ;;  %v1227_v27 = vld [vmem:[%s1508_s27 + $0x8] sm:$0xff]   ;;  %v1229_v29 = vld [vmem:[%s1508_s27 + $0x10] sm:$0xff]   ;;  %p976_p5 = scmp.ne.s32.totalorder %s1327_s20, 1 }
  0x49   : > { %s374_s5 = sshra.s32 %s958_s0, 3  ;;  %v1226_v18 = vld [vmem:[%s1508_s27 + $0x20] sm:$0xff]   ;;  %1095 = vmatprep.mubr.bf16.mxu0 %v1225_v17  ;;  %v1228_v28 = vld [vmem:[%s1508_s27 + $0x28] sm:$0xff]   ;;  %v1230_v30 = vld [vmem:[%s1508_s27 + $0x30] sm:$0xff]  }
  0x4a   : > { %s959_s14 = sshll.u32 %s374_s5, 2  ;;  %1103 = vmatprep.mubr.bf16.mxu1 %v1226_v18  ;;  %v1231_v31 = vld [vmem:[%s1508_s27 + $0x18] sm:$0xff]   ;;  %v394_v35 = vld [vmem:[#allocation2] sm:$0xff]  ;;  %v395_v45 = vld [vmem:[#allocation2 + $0x8] sm:$0xff] }
  0x4b   : > { %s1519_s30 = scalar_lea.vmem %s1646_s1, %s959_s14  ;;  %v1232_v32 = vld [vmem:[%s1508_s27 + $0x38] sm:$0xff]   ;;  %v396_v33 = vld [vmem:[#allocation2 + $0x10] sm:$0xff] }
  0x4c   : > { %v1217_v19 = vld [vmem:[%s1519_s30] sm:$0xff]   ;;  %v1218_v20 = vld [vmem:[%s1519_s30 + $0x8] sm:$0xff]   ;;  %v1219_v21 = vld [vmem:[%s1519_s30 + $0x10] sm:$0xff]  }
  0x4d   : > { %1079 = vmatprep.subr.bf16.mxu0 %v1217_v19  ;;  %1111 = vmatprep.subr.bf16.mxu1 %v1217_v19  ;;  %v1220_v22 = vld [vmem:[%s1519_s30 + $0x18] sm:$0xff]   ;;  %v1221_v23 = vld [vmem:[%s1519_s30 + $0x20] sm:$0xff]   ;;  %v1222_v24 = vld [vmem:[%s1519_s30 + $0x28] sm:$0xff]  }
  0x4e   : > { %1080 = vmatpush3.bf16.msra.mxu0 %v1217_v19  ;;  %1119 = vmatpush3.bf16.msra.mxu1 %v1217_v19  ;;  %v1223_v25 = vld [vmem:[%s1519_s30 + $0x30] sm:$0xff]   ;;  %v1224_v26 = vld [vmem:[%s1519_s30 + $0x38] sm:$0xff]   ;;  %v402_v36 = vld [vmem:[#allocation2 + $0x40] sm:$0xff] }
  0x4f   : > { %1081 = vmatprep.subr.bf16.mxu0 %v1218_v20  ;;  %1112 = vmatprep.subr.bf16.mxu1 %v1218_v20  ;;  %v404_v34 = vld [vmem:[#allocation2 + $0x50] sm:$0xff]  ;;  %v397_v39 = vld [vmem:[#allocation2 + $0x18] sm:$0xff]  ;;  %v403_v46 = vld [vmem:[#allocation2 + $0x48] sm:$0xff] }
  0x50   : > { %v405_v40 = vld [vmem:[#allocation2 + $0x58] sm:$0xff]  ;;  %v400_v57 = vld [vmem:[#allocation2 + $0x30] sm:$0xff]  ;;  %v398_v59 = vld [vmem:[#allocation2 + $0x20] sm:$0xff] }
  0x51   : > { %v408_v58 = vld [vmem:[#allocation2 + $0x70] sm:$0xff]  ;;  %v406_v60 = vld [vmem:[#allocation2 + $0x60] sm:$0xff]  ;;  %v401_v63 = vld [vmem:[#allocation2 + $0x38] sm:$0xff] }
  0x52   : > { %1082 = vmatpush3.bf16.msra.mxu0 %v1218_v20  ;;  %1120 = vmatpush3.bf16.msra.mxu1 %v1218_v20  ;;  %v409_v0 = vld [vmem:[#allocation2 + $0x78] sm:$0xff]  ;;  %v399_v5 = vld [vmem:[#allocation2 + $0x28] sm:$0xff] }
  0x53   : > { %1083 = vmatprep.subr.bf16.mxu0 %v1219_v21  ;;  %1113 = vmatprep.subr.bf16.mxu1 %v1219_v21  ;;  %v407_v6 = vld [vmem:[#allocation2 + $0x68] sm:$0xff] }
  0x56   : > { %1084 = vmatpush3.bf16.msra.mxu0 %v1219_v21  ;;  %1121 = vmatpush3.bf16.msra.mxu1 %v1219_v21 }
  0x57   : > { %1085 = vmatprep.subr.bf16.mxu0 %v1220_v22  ;;  %1114 = vmatprep.subr.bf16.mxu1 %v1220_v22 }
  0x5a   : > { %1086 = vmatpush3.bf16.msra.mxu0 %v1220_v22  ;;  %1122 = vmatpush3.bf16.msra.mxu1 %v1220_v22 }
  0x5b   : > { %1087 = vmatprep.subr.bf16.mxu0 %v1221_v23  ;;  %1115 = vmatprep.subr.bf16.mxu1 %v1221_v23 }
  0x5e   : > { %1088 = vmatpush3.bf16.msra.mxu0 %v1221_v23  ;;  %1123 = vmatpush3.bf16.msra.mxu1 %v1221_v23 }
  0x5f   : > { %1089 = vmatprep.subr.bf16.mxu0 %v1222_v24  ;;  %1116 = vmatprep.subr.bf16.mxu1 %v1222_v24 }
  0x62   : > { %1090 = vmatpush3.bf16.msra.mxu0 %v1222_v24  ;;  %1124 = vmatpush3.bf16.msra.mxu1 %v1222_v24 }
  0x63   : > { %1091 = vmatprep.subr.bf16.mxu0 %v1223_v25  ;;  %1117 = vmatprep.subr.bf16.mxu1 %v1223_v25 }
  0x66   : > { %1092 = vmatpush3.bf16.msra.mxu0 %v1223_v25  ;;  %1125 = vmatpush3.bf16.msra.mxu1 %v1223_v25 }
  0x67   : > { %1093 = vmatprep.subr.bf16.mxu0 %v1224_v26  ;;  %1118 = vmatprep.subr.bf16.mxu1 %v1224_v26 }
  0x6a   : > { %1094 = vmatpush3.bf16.msra.mxu0 %v1224_v26  ;;  %1126 = vmatpush3.bf16.msra.mxu1 %v1224_v26 }
  0x6d   : > { %1096 = vmatmul.mubr.bf16.vlgmr.msra.gmra.mrb[0].mxu0 %v1227_v27  ;;  %1104 = vmatmul.mubr.bf16.vlgmr.msra.gmra.mrb[0].mxu1 %v1228_v28 }
  0x6e   : > { %1099 = vmatprep.mubr.bf16.mxu0 %v1229_v29  ;;  %1107 = vmatprep.mubr.bf16.mxu1 %v1230_v30 }
  0x75   : > { %1100 = vmatmul.mubr.bf16.gmra.mrb[4].mxu0 %v1231_v31  ;;  %1108 = vmatmul.mubr.bf16.gmra.mrb[4].mxu1 %v1232_v32 }
 0x140   : > { %v1097_v37 = vpop.f32.mrb[0].mxu0  ;;  %v1105_v38 = vpop.f32.mrb[0].mxu1 }
 0x141   : > { %v621_v41 = vadd.f32 %v1097_v37, %v396_v33  ;;  %v629_v42 = vadd.f32 %v1105_v38, %v404_v34  ;;  %v556_v43 = vpop.f32.mrb[1].mxu0  ;;  %v588_v44 = vpop.f32.mrb[1].mxu1 }
 0x142   : > { %v619_v47 = vadd.f32 %v556_v43, %v394_v35  ;;  %v627_v48 = vadd.f32 %v588_v44, %v402_v36  ;;  %v1098_v49 = vpop.f32.mrb[2].mxu0  ;;  %v1106_v50 = vpop.f32.mrb[2].mxu1 }
 0x143   : > { %637 = vst [vmem:[#allocation2 + $0x10] sm:$0xff] %v621_v41  ;;  %645 = vst [vmem:[#allocation2 + $0x50] sm:$0xff] %v629_v42  ;;  %v622_v51 = vadd.f32 %v1098_v49, %v397_v39  ;;  %v630_v52 = vadd.f32 %v1106_v50, %v405_v40  ;;  %v559_v53 = vpop.f32.mrb[3].mxu0  ;;  %v591_v54 = vpop.f32.mrb[3].mxu1  ;;  %v751_v40 = vld [vmem:[%s1501_s6] sm:$0xff] (!%p976_p5)  ;;  %v752_v41 = vld [vmem:[%s1501_s6 + $0x8] sm:$0xff] (!%p976_p5) }
 0x144   : > { %635 = vst [vmem:[#allocation2] sm:$0xff] %v619_v47  ;;  %643 = vst [vmem:[#allocation2 + $0x40] sm:$0xff] %v627_v48  ;;  %v620_v55 = vadd.f32 %v559_v53, %v395_v45  ;;  %v628_v56 = vadd.f32 %v591_v54, %v403_v46  ;;  %v753_v45 = vld [vmem:[%s1501_s6 + $0x10] sm:$0xff] (!%p976_p5)  ;;  %v754_v46 = vld [vmem:[%s1501_s6 + $0x18] sm:$0xff] (!%p976_p5) }
 0x145   : > { %638 = vst [vmem:[#allocation2 + $0x18] sm:$0xff] %v622_v51  ;;  %646 = vst [vmem:[#allocation2 + $0x58] sm:$0xff] %v630_v52  ;;  %v755_v47 = vld [vmem:[%s1501_s6 + $0x20] sm:$0xff] (!%p976_p5)  ;;  %v756_v51 = vld [vmem:[%s1501_s6 + $0x28] sm:$0xff] (!%p976_p5) }
 0x146   : > { %636 = vst [vmem:[#allocation2 + $0x8] sm:$0xff] %v620_v55  ;;  %644 = vst [vmem:[#allocation2 + $0x48] sm:$0xff] %v628_v56  ;;  %v757_v52 = vld [vmem:[%s1501_s6 + $0x30] sm:$0xff] (!%p976_p5)  ;;  %v758_v53 = vld [vmem:[%s1501_s6 + $0x38] sm:$0xff] (!%p976_p5) }
 0x148   : > { %v1101_v61 = vpop.f32.mrb[4].mxu0  ;;  %v1109_v62 = vpop.f32.mrb[4].mxu1  ;;  %654 = sbr.rel (%p976_p5) target bundleno = 348 (0x15c), region = 81 }
 0x149   : > { %v625_v1 = vadd.f32 %v1101_v61, %v400_v57  ;;  %v633_v2 = vadd.f32 %v1109_v62, %v408_v58  ;;  %v572_v3 = vpop.f32.mrb[5].mxu0  ;;  %v604_v4 = vpop.f32.mrb[5].mxu1  ;;  %v759_v57 = vld [vmem:[%s1501_s6 + $0x40] sm:$0xff] (!%p976_p5)  ;;  %v760_v58 = vld [vmem:[%s1501_s6 + $0x48] sm:$0xff] (!%p976_p5) }
 0x14a   : > { %v623_v7 = vadd.f32 %v572_v3, %v398_v59  ;;  %v631_v8 = vadd.f32 %v604_v4, %v406_v60  ;;  %v1102_v9 = vpop.f32.mrb[6].mxu0  ;;  %v1110_v10 = vpop.f32.mrb[6].mxu1  ;;  %v657_v19 = vld [vmem:[#allocation2 + $0x10] sm:$0xff] (!%p976_p5) }
 0x14b   : > { %641 = vst [vmem:[#allocation2 + $0x30] sm:$0xff] %v625_v1  ;;  %649 = vst [vmem:[#allocation2 + $0x70] sm:$0xff] %v633_v2  ;;  %v626_v11 = vadd.f32 %v1102_v9, %v401_v63  ;;  %v634_v12 = vadd.f32 %v1110_v10, %v409_v0  ;;  %v575_v13 = vpop.f32.mrb[7].mxu0  ;;  %v607_v14 = vpop.f32.mrb[7].mxu1  ;;  %v655_v17 = vld [vmem:[#allocation2] sm:$0xff] (!%p976_p5)  ;;  %v665_v31 = vld [vmem:[#allocation2 + $0x50] sm:$0xff] (!%p976_p5)  ;;  %v769_v48 = vadd.f32 (!%p976_p5), %v753_v45, %v657_v19 }
 0x14c   : > { %639 = vst [vmem:[#allocation2 + $0x20] sm:$0xff] %v623_v7  ;;  %647 = vst [vmem:[#allocation2 + $0x60] sm:$0xff] %v631_v8  ;;  %v624_v15 = vadd.f32 %v575_v13, %v399_v5  ;;  %v632_v16 = vadd.f32 %v607_v14, %v407_v6  ;;  %v658_v21 = vld [vmem:[#allocation2 + $0x18] sm:$0xff] (!%p976_p5)  ;;  %v663_v28 = vld [vmem:[#allocation2 + $0x40] sm:$0xff] (!%p976_p5)  ;;  %v767_v43 = vadd.f32 (!%p976_p5), %v751_v40, %v655_v17 }
 0x14d   : > { %642 = vst [vmem:[#allocation2 + $0x38] sm:$0xff] %v626_v11  ;;  %650 = vst [vmem:[#allocation2 + $0x78] sm:$0xff] %v634_v12  ;;  %v656_v18 = vld [vmem:[#allocation2 + $0x8] sm:$0xff] (!%p976_p5)  ;;  %v1024_v24 = vpack.c.bf16 (!%p976_p5), %v658_v21, %v657_v19  ;;  %v666_v32 = vld [vmem:[#allocation2 + $0x58] sm:$0xff] (!%p976_p5)  ;;  %v770_v49 = vadd.f32 (!%p976_p5), %v754_v46, %v658_v21  ;;  %v775_v60 = vadd.f32 (!%p976_p5), %v759_v57, %v663_v28 }
 0x14e   : > { %640 = vst [vmem:[#allocation2 + $0x28] sm:$0xff] %v624_v15  ;;  %648 = vst [vmem:[#allocation2 + $0x68] sm:$0xff] %v632_v16  ;;  %v1019_v20 = vpack.c.bf16 (!%p976_p5), %v656_v18, %v655_v17  ;;  %v664_v30 = vld [vmem:[#allocation2 + $0x48] sm:$0xff] (!%p976_p5)  ;;  %v1044_v34 = vpack.c.bf16 (!%p976_p5), %v666_v32, %v665_v31  ;;  %v768_v44 = vadd.f32 (!%p976_p5), %v752_v41, %v656_v18  ;;  %v761_v59 = vld [vmem:[%s1501_s6 + $0x50] sm:$0xff] (!%p976_p5) }
 0x14f   : > { %1056 = vst [vmem:[%s1510_s18 + $0x8] sm:$0xff] %v1024_v24   ;;  %v1039_v33 = vpack.c.bf16 %v664_v30, %v663_v28  ;;  %783 = vst [vmem:[%s1506_s28] sm:$0xff] %v767_v43  ;;  %v776_v61 = vadd.f32 %v760_v58, %v664_v30  ;;  %v777_v62 = vadd.f32 %v761_v59, %v665_v31  ;;  %v762_v63 = vld [vmem:[%s1501_s6 + $0x58] sm:$0xff]  ;;  %v763_v0 = vld [vmem:[%s1501_s6 + $0x60] sm:$0xff] }
 0x150   : > { %1020 = vst [vmem:[%s1510_s18] sm:$0xff] %v1019_v20   ;;  %1060 = vst [vmem:[%s1510_s18 + $0x28] sm:$0xff] %v1044_v34   ;;  %v764_v1 = vld [vmem:[%s1501_s6 + $0x68] sm:$0xff]  ;;  %v778_v2 = vadd.f32 %v762_v63, %v666_v32  ;;  %v765_v5 = vld [vmem:[%s1501_s6 + $0x70] sm:$0xff] }
 0x151   : > { %1059 = vst [vmem:[%s1510_s18 + $0x20] sm:$0xff] %v1039_v33   ;;  %784 = vst [vmem:[%s1506_s28 + $0x8] sm:$0xff] %v768_v44  ;;  %v766_v6 = vld [vmem:[%s1501_s6 + $0x78] sm:$0xff] }
 0x152   : > { %v661_v26 = vld [vmem:[#allocation2 + $0x30] sm:$0xff]  ;;  %785 = vst [vmem:[%s1506_s28 + $0x10] sm:$0xff] %v769_v48  ;;  %786 = vst [vmem:[%s1506_s28 + $0x18] sm:$0xff] %v770_v49 }
 0x153   : > { %v659_v22 = vld [vmem:[#allocation2 + $0x20] sm:$0xff]  ;;  %v669_v37 = vld [vmem:[#allocation2 + $0x70] sm:$0xff]  ;;  %v773_v55 = vadd.f32 %v757_v52, %v661_v26  ;;  %791 = vst [vmem:[%s1506_s28 + $0x40] sm:$0xff] %v775_v60  ;;  %792 = vst [vmem:[%s1506_s28 + $0x48] sm:$0xff] %v776_v61 }
 0x154   : > { %v662_v27 = vld [vmem:[#allocation2 + $0x38] sm:$0xff]  ;;  %v667_v35 = vld [vmem:[#allocation2 + $0x60] sm:$0xff]  ;;  %v771_v50 = vadd.f32 %v755_v47, %v659_v22  ;;  %793 = vst [vmem:[%s1506_s28 + $0x50] sm:$0xff] %v777_v62  ;;  %v781_v7 = vadd.f32 %v765_v5, %v669_v37  ;;  %794 = vst [vmem:[%s1506_s28 + $0x58] sm:$0xff] %v778_v2 }
 0x155   : > { %v660_v23 = vld [vmem:[#allocation2 + $0x28] sm:$0xff]  ;;  %v1034_v29 = vpack.c.bf16 %v662_v27, %v661_v26  ;;  %v670_v39 = vld [vmem:[#allocation2 + $0x78] sm:$0xff]  ;;  %v774_v56 = vadd.f32 %v758_v53, %v662_v27  ;;  %789 = vst [vmem:[%s1506_s28 + $0x30] sm:$0xff] %v773_v55  ;;  %v779_v3 = vadd.f32 %v763_v0, %v667_v35 }
 0x156   : > { %v1029_v25 = vpack.c.bf16 %v660_v23, %v659_v22  ;;  %v668_v36 = vld [vmem:[#allocation2 + $0x68] sm:$0xff]  ;;  %v1054_v42 = vpack.c.bf16 %v670_v39, %v669_v37  ;;  %v772_v54 = vadd.f32 %v756_v51, %v660_v23  ;;  %787 = vst [vmem:[%s1506_s28 + $0x20] sm:$0xff] %v771_v50  ;;  %v782_v8 = vadd.f32 %v766_v6, %v670_v39 }
 0x157   : > { %1058 = vst [vmem:[%s1510_s18 + $0x18] sm:$0xff] %v1034_v29   ;;  %v1049_v38 = vpack.c.bf16 %v668_v36, %v667_v35  ;;  %790 = vst [vmem:[%s1506_s28 + $0x38] sm:$0xff] %v774_v56  ;;  %v780_v4 = vadd.f32 %v764_v1, %v668_v36 }
 0x158   : > { %1057 = vst [vmem:[%s1510_s18 + $0x10] sm:$0xff] %v1029_v25   ;;  %1062 = vst [vmem:[%s1510_s18 + $0x38] sm:$0xff] %v1054_v42  }
 0x159   : > { %1061 = vst [vmem:[%s1510_s18 + $0x30] sm:$0xff] %v1049_v38   ;;  %788 = vst [vmem:[%s1506_s28 + $0x28] sm:$0xff] %v772_v54 }
 0x15a   : > { %795 = vst [vmem:[%s1506_s28 + $0x60] sm:$0xff] %v779_v3  ;;  %796 = vst [vmem:[%s1506_s28 + $0x68] sm:$0xff] %v780_v4 }
 0x15b   : > { %797 = vst [vmem:[%s1506_s28 + $0x70] sm:$0xff] %v781_v7  ;;  %798 = vst [vmem:[%s1506_s28 + $0x78] sm:$0xff] %v782_v8 }
 0x15c PF: > { %s1015_s20 = sshll.u32 %s1331_s21, 10  ;;  %s818_s6 = sshll.u32 %s1510_s18, 4  ;;  %s1583_s6 = int_to_ptr.vmem [resolvable:$true] %s818_s6 }
 0x15d   : > { %s1580_s9 = scalar_lea.hbm %s1648_s3, %s1015_s20  ;;  %s1587_s29 = scalar_lea.sflag [#allocation5], %s328_s13 }
 0x15e   : > { %s1233_s28 = scalar_lea.vmem %s1583_s6, 1024  ;;  %s1346_s21 = smov [#allocation4]  }
 0x15f   : > { %p1234_p6 = scmp.ne.s32.totalorder %s1583_s6, %s1233_s28  ;;  %s1237_s0 = sshll.u32 %s1346_s21, 4  ;;  %s1238_s0 = int_to_ptr.vmem [resolvable:$false] %s1237_s0 }
 0x160   : > { %s1239_s5 = scalar_lea.vmem %s1238_s0, 2048  ;;  %p1240_p10 = scmp.lt.s32.totalorder %s1583_s6, %s1238_s0 }
 0x161   : > { %p1235_p8 = pnand %p1234_p6, %p1446_p7  ;;  %p1241_p11 = scmp.lt.s32.totalorder %s1239_s5, %s1233_s28 }
 0x163   : > { %p1236_p9 = pneg %p1235_p8  ;;  %p1242_p13 = por %p1241_p11, %p1240_p10 }
 0x165   : > { %p1243_p0 = pnand %p1242_p13, %p1236_p9 }
 0x167   : > { %1246 = shalt.err (!%p1243_p0)
}
 0x168   : > { %s1247_s13 = scalar_lea.hbm %s1580_s9, 1024  ;;  %s1251_s25 = scalar_lea.hbm %s1648_s3, 2048 }
 0x169   : > { %p1248_p1 = scmp.ne.s32.totalorder %s1580_s9, %s1247_s13  ;;  %p1252_p4 = scmp.lt.u32.totalorder %s1580_s9, %s1648_s3 }
 0x16a   : > { %p1253_p5 = scmp.lt.u32.totalorder %s1251_s25, %s1247_s13  ;;  %p1255_p8 = scmp.lt.u32.totalorder %s1247_s13, %s1580_s9 }
 0x16b   : > { %p1249_p2 = pnand %p1248_p1, %p1446_p7 }
 0x16c   : > { %p1254_p6 = por %p1253_p5, %p1252_p4 }
 0x16d   : > { %p1250_p3 = pneg %p1249_p2 }
 0x16e   : > { %p1256_p9 = por %p1255_p8, %p1254_p6 }
 0x170   : > { %p1257_p10 = pnand %p1256_p9, %p1250_p3 }
 0x172   : > { %1260 = shalt.err (!%p1257_p10)
}
 0x173   : > { %s1347_s20 = smov 64   ;;  %s1348_s27 = smov 4  }
 0x174   : > { %1127 = dma.vmem_to_hbm [thread:$0]  (%p1446_p7), %s1583_s6, 1024, %s1580_s9, %s1587_s29, %s1347_s20, %s1347_s20, %s1348_s27  }
 0x175 PF: > { %p1133_p11 = scmp.ge.s32.totalorder %s1343_s24, 2  ;;  %s837_s8 = sand.u32 1, %s1307_s15  }
 0x176   : > { %s838_s28 = scalar_lea.sflag [#allocation5], %s837_s8 }
 0x177   : > { %p1130_p13 = pnand %p1133_p11, %p1454_p12 }
 0x179   : > { %1302 = dma.done.wait (!%p1130_p13), %s838_s28, 1024  }
 0x17a   : > { %1304 = vsyncadd (!%p1130_p13), %s838_s28, 4294966272  ;;  %s18_s24 = sadd.s32 1, %s1343_s24   ;;  %s1659_s7 = sld [smem:[#allocation7_spill]] }
 0x17b   : > { %p15_p0 = scmp.ge.s32.totalorder %s18_s24, 6   ;;  %s1660_s9 = sld [smem:[#allocation8_spill]] }
 0x17c   : > { %s1661_s15 = smov %s1311_s16  ;;  %s1662_s16 = smov %s1315_s17 }
 0x17d   : > { %s1663_s17 = smov %s1459_s11  ;;  %s1664_s18 = smov %s1323_s19 }
 0x17e   : > { %s1665_s19 = smov %s1462_s12  ;;  %s1666_s20 = smov %s1335_s22 }
 0x17f   : > { %s1667_s21 = smov %s1339_s23  ;;  %17 = sbr.rel (!%p15_p0) target bundleno = 8 (0x8), region = 137 }
 0x180   : > { %s1668_s22 = smov %s1659_s7 }
 0x181   : > { %s1669_s23 = smov %s1660_s9 }
 0x186   :  { %851 = vsyncpa [#allocation5], 1 }
 0x187   :  { %853 = vsyncpa [#allocation5 + $0x1], 1 }

// kernel: lightgcn_forward.7
= control target key start
LH: loop header
LB: loop body
LE: loop exit
PB: predicated region body
PF: predicated region fallthrough
CT: control target
= control target key end

     0   :  { %s1262_s15 = smov 0   ;;  %s1264_s16 = smov 0   ;;  %s1446_s0 = inlined_call_operand.vmem [shape: bf16[256,256], index: 0, kind: input, shape index: {}]   ;;  %s1447_s1 = inlined_call_operand.vmem [shape: bf16[256,128], index: 1, kind: input, shape index: {}]   ;;  %s1448_s2 = inlined_call_operand.vmem [shape: f32[256,128], index: 2, kind: input, shape index: {}]   ;;  %s1449_s3 = inlined_call_operand.vmem [shape: bf16[256,128], index: 3, kind: output, shape index: {0}]   ;;  %s1450_s4 = inlined_call_operand.vmem [shape: f32[256,128], index: 4, kind: output, shape index: {1}]  }
   0x1   :  { %s1266_s17 = smov 0   ;;  %s1268_s18 = smov 0  }
   0x2   :  { %s1270_s19 = smov 0   ;;  %s1272_s20 = smov 0  }
   0x3   :  { %s1274_s21 = smov 0  }
   0x4 LB: > { %s24_s22 = sadd.s32 1, %s1226_s19  ;;  %s27_s23 = sadd.s32 1, %s1230_s20  ;;  %s1234_s21 = sphi %s1274_s21, %s15_s21   ;;  %s1230_s20 = sphi %s1272_s20, %s1456_s20   ;;  %s1226_s19 = sphi %s1270_s19, %s1455_s19   ;;  %s1222_s18 = sphi %s1268_s18, %s1454_s18   ;;  %s1218_s17 = sphi %s1266_s17, %s1453_s17   ;;  %s1214_s16 = sphi %s1264_s16, %s1452_s16   ;;  %s1210_s15 = sphi %s1262_s15, %s1451_s15  }
   0x5   : > { %p25_p0 = scmp.ge.s32.totalorder %s24_s22, 2  ;;  %p43_p1 = scmp.ne.s32.totalorder %s1214_s16, %s1210_s15 }
   0x6   : > { %p44_p2 = scmp.eq.s32.totalorder %s1234_s21, 0  ;;  %s36_s27 = sadd.s32 1, %s1214_s16 }
   0x7   : > { %s1458_s22 = smov (%p25_p0, %s24_s22), 0  ;;  %s1460_s23 = smov (!%p25_p0, %s27_s23), %s1230_s20 }
   0x8   : > { %p45_p3 = por %p44_p2, %p43_p1  ;;  %p29_p4 = scmp.ge.s32.totalorder %s1460_s23, 2 }
   0x9   : > { %s32_s24 = ssub.s32 %s1226_s19, %s1458_s22  ;;  %p928_p6 = scmp.ge.s32.totalorder %s1234_s21, 4 }
   0xa   : > { %s1462_s23 = smov (%p29_p4, %s1460_s23), 0 }
   0xb   : > { %s31_s25 = ssub.s32 %s1230_s20, %s1462_s23  ;;  %171 = sbr.rel (%p928_p6) target bundleno = 34 (0x22), region = 20 }
   0xc   : > { %s33_s26 = sor.u32 %s32_s24, %s31_s25 }
   0xd   : > { %p34_p5 = scmp.eq.s32.totalorder %s33_s26, 0 }
   0xf   : > { %s1313_s28 = scalar_select %p34_p5, %s1214_s16, %s36_s27  }
  0x12   : > { %174 = sbr.rel (!%p45_p3) target bundleno = 34 (0x22), region = 24  ;;  %s176_s29 = sand.u32 (%p45_p3), 1, %s1214_s16  }
  0x13   : > { %s979_s30 = sshll.u32 (%p45_p3), %s1230_s20, 5  ;;  %s929_s5 = sshll.u32 (%p45_p3), %s176_s29, 6 }
  0x14   : > { %s181_s6 = sadd.s32 (%p45_p3), %s1226_s19, %s979_s30  ;;  %s178_s11 = scalar_lea.vmem (%p45_p3), [#allocation3], %s929_s5 }
  0x15   : > { %s932_s7 = sshll.u32 (%p45_p3), %s181_s6, 2 }
  0x16   : > { %s1322_s10 = scalar_lea.vmem (%p45_p3), %s1446_s0, %s932_s7 }
  0x17   : > { %v199_v0 = vld [vmem:[%s1322_s10] sm:$0xf] (%p45_p3)  ;;  %v201_v1 = vld [vmem:[%s1322_s10 + $0x8] sm:$0xf] (%p45_p3)  ;;  %v203_v2 = vld [vmem:[%s1322_s10 + $0x10] sm:$0xf] (%p45_p3) }
  0x18   : > { %200 = vst [vmem:[%s178_s11] sm:$0xf] (%p45_p3), %v199_v0  ;;  %202 = vst [vmem:[%s178_s11 + $0x4] sm:$0xf] (%p45_p3), %v201_v1  ;;  %v205_v3 = vld [vmem:[%s1322_s10 + $0x18] sm:$0xf] (%p45_p3) }
  0x19   : > { %204 = vst [vmem:[%s178_s11 + $0x8] sm:$0xf] %v203_v2  ;;  %v207_v4 = vld [vmem:[%s1322_s10 + $0x20] sm:$0xf]  ;;  %v209_v5 = vld [vmem:[%s1322_s10 + $0x28] sm:$0xf] }
  0x1a   : > { %206 = vst [vmem:[%s178_s11 + $0xc] sm:$0xf] %v205_v3  ;;  %208 = vst [vmem:[%s178_s11 + $0x10] sm:$0xf] %v207_v4  ;;  %v211_v6 = vld [vmem:[%s1322_s10 + $0x30] sm:$0xf] }
  0x1b   : > { %210 = vst [vmem:[%s178_s11 + $0x14] sm:$0xf] %v209_v5  ;;  %v213_v7 = vld [vmem:[%s1322_s10 + $0x38] sm:$0xf]  ;;  %v215_v8 = vld [vmem:[%s1322_s10 + $0x40] sm:$0xf] }
  0x1c   : > { %212 = vst [vmem:[%s178_s11 + $0x18] sm:$0xf] %v211_v6  ;;  %214 = vst [vmem:[%s178_s11 + $0x1c] sm:$0xf] %v213_v7  ;;  %v217_v9 = vld [vmem:[%s1322_s10 + $0x48] sm:$0xf] }
  0x1d   : > { %216 = vst [vmem:[%s178_s11 + $0x20] sm:$0xf] %v215_v8  ;;  %v219_v10 = vld [vmem:[%s1322_s10 + $0x50] sm:$0xf]  ;;  %v221_v11 = vld [vmem:[%s1322_s10 + $0x58] sm:$0xf] }
  0x1e   : > { %218 = vst [vmem:[%s178_s11 + $0x24] sm:$0xf] %v217_v9  ;;  %220 = vst [vmem:[%s178_s11 + $0x28] sm:$0xf] %v219_v10  ;;  %v223_v12 = vld [vmem:[%s1322_s10 + $0x60] sm:$0xf] }
  0x1f   : > { %222 = vst [vmem:[%s178_s11 + $0x2c] sm:$0xf] %v221_v11  ;;  %v225_v13 = vld [vmem:[%s1322_s10 + $0x68] sm:$0xf]  ;;  %v227_v14 = vld [vmem:[%s1322_s10 + $0x70] sm:$0xf] }
  0x20   : > { %224 = vst [vmem:[%s178_s11 + $0x30] sm:$0xf] %v223_v12  ;;  %226 = vst [vmem:[%s178_s11 + $0x34] sm:$0xf] %v225_v13  ;;  %v229_v15 = vld [vmem:[%s1322_s10 + $0x78] sm:$0xf] }
  0x21   : > { %228 = vst [vmem:[%s178_s11 + $0x38] sm:$0xf] %v227_v14  ;;  %230 = vst [vmem:[%s178_s11 + $0x3c] sm:$0xf] %v229_v15 }
  0x22 PF: > { %p933_p7 = scmp.ge.s32.totalorder %s1234_s21, 1  ;;  %p293_p8 = scmp.lt.s32.totalorder %s1234_s21, 5 }
  0x24   : > { %p294_p9 = pnand %p933_p7, %p293_p8 }
  0x25   : > { %s300_s12 = sand.u32 (!%p294_p9), 1, %s1210_s15   ;;  %s935_s13 = sshll.u32 (!%p294_p9), %s1222_s18, 4 }
  0x26   : > { %297 = sbr.rel (%p294_p9) target bundleno = 331 (0x14b), region = 69  ;;  %s934_s14 = sshll.u32 (!%p294_p9), %s300_s12, 6 }
  0x27   : > { %p337_p10 = scmp.lt.s32.totalorder (!%p294_p9), %s935_s13, 31  ;;  %s1359_s18 = scalar_lea.vmem (!%p294_p9), [#allocation3], %s934_s14 }
  0x28   : > { %p941_p11 = scmp.ne.s32.totalorder (!%p294_p9), %s1218_s17, 0 }
  0x2d   : > { %s1464_s13 = smov (!%p337_p10, %s935_s13), 31  ;;  %358 = sbr.rel (%p941_p11) target bundleno = 55 (0x37), region = 77 }
  0x2e   : > { %s936_s24 = sshll.u32 %s1464_s13, 3  ;;  %s938_s25 = sshll.u32 %s1464_s13, 2  ;;  %v1236_v16 = vmov (!%p941_p11), 0.0  }
  0x2f   : > { %s1347_s29 = scalar_lea.vmem %s1448_s2, %s936_s24  ;;  %s1352_s6 = scalar_lea.vmem %s1449_s3, %s938_s25  ;;  %359 = vst [vmem:[#allocation2] sm:$0xff] (!%p941_p11), %v1236_v16  ;;  %360 = vst [vmem:[#allocation2 + $0x8] sm:$0xff] (!%p941_p11), %v1236_v16 }
  0x30   : > { %s1357_s15 = scalar_lea.vmem %s1450_s4, %s936_s24  ;;  %361 = vst [vmem:[#allocation2 + $0x10] sm:$0xff] (!%p941_p11), %v1236_v16  ;;  %362 = vst [vmem:[#allocation2 + $0x18] sm:$0xff] (!%p941_p11), %v1236_v16 }
  0x31   : > { %363 = vst [vmem:[#allocation2 + $0x20] sm:$0xff] (!%p941_p11), %v1236_v16  ;;  %364 = vst [vmem:[#allocation2 + $0x28] sm:$0xff] (!%p941_p11), %v1236_v16 }
  0x32   : > { %365 = vst [vmem:[#allocation2 + $0x30] sm:$0xff] (!%p941_p11), %v1236_v16  ;;  %366 = vst [vmem:[#allocation2 + $0x38] sm:$0xff] (!%p941_p11), %v1236_v16 }
  0x33   : > { %367 = vst [vmem:[#allocation2 + $0x40] sm:$0xff] (!%p941_p11), %v1236_v16  ;;  %368 = vst [vmem:[#allocation2 + $0x48] sm:$0xff] (!%p941_p11), %v1236_v16 }
  0x34   : > { %369 = vst [vmem:[#allocation2 + $0x50] sm:$0xff] %v1236_v16  ;;  %370 = vst [vmem:[#allocation2 + $0x58] sm:$0xff] %v1236_v16 }
  0x35   : > { %371 = vst [vmem:[#allocation2 + $0x60] sm:$0xff] %v1236_v16  ;;  %372 = vst [vmem:[#allocation2 + $0x68] sm:$0xff] %v1236_v16 }
  0x36   : > { %373 = vst [vmem:[#allocation2 + $0x70] sm:$0xff] %v1236_v16  ;;  %374 = vst [vmem:[#allocation2 + $0x78] sm:$0xff] %v1236_v16 }
  0x37 PF: > { %s942_s9 = sshll.u32 %s1218_s17, 7  ;;  %v1172_v17 = vld [vmem:[%s1359_s18] sm:$0xff]   ;;  %v1174_v27 = vld [vmem:[%s1359_s18 + $0x8] sm:$0xff]   ;;  %v1176_v29 = vld [vmem:[%s1359_s18 + $0x10] sm:$0xff]   ;;  %p960_p12 = scmp.ne.s32.totalorder %s1218_s17, 1 }
  0x38   : > { %s376_s10 = sshra.s32 %s942_s9, 3  ;;  %v1173_v18 = vld [vmem:[%s1359_s18 + $0x20] sm:$0xff]   ;;  %1075 = vmatprep.mubr.bf16.mxu0 %v1172_v17  ;;  %v1175_v28 = vld [vmem:[%s1359_s18 + $0x28] sm:$0xff]   ;;  %v1177_v30 = vld [vmem:[%s1359_s18 + $0x30] sm:$0xff]  }
  0x39   : > { %s943_s11 = sshll.u32 %s376_s10, 2  ;;  %1083 = vmatprep.mubr.bf16.mxu1 %v1173_v18  ;;  %v1178_v31 = vld [vmem:[%s1359_s18 + $0x18] sm:$0xff]   ;;  %v396_v35 = vld [vmem:[#allocation2] sm:$0xff]  ;;  %v397_v45 = vld [vmem:[#allocation2 + $0x8] sm:$0xff] }
  0x3a   : > { %s1368_s14 = scalar_lea.vmem %s1447_s1, %s943_s11  ;;  %v1179_v32 = vld [vmem:[%s1359_s18 + $0x38] sm:$0xff]   ;;  %v398_v33 = vld [vmem:[#allocation2 + $0x10] sm:$0xff] }
  0x3b   : > { %v1164_v19 = vld [vmem:[%s1368_s14] sm:$0xff]   ;;  %v1165_v20 = vld [vmem:[%s1368_s14 + $0x8] sm:$0xff]   ;;  %v1166_v21 = vld [vmem:[%s1368_s14 + $0x10] sm:$0xff]  }
  0x3c   : > { %1059 = vmatprep.subr.bf16.mxu0 %v1164_v19  ;;  %1091 = vmatprep.subr.bf16.mxu1 %v1164_v19  ;;  %v1167_v22 = vld [vmem:[%s1368_s14 + $0x18] sm:$0xff]   ;;  %v1168_v23 = vld [vmem:[%s1368_s14 + $0x20] sm:$0xff]   ;;  %v1169_v24 = vld [vmem:[%s1368_s14 + $0x28] sm:$0xff]  }
  0x3d   : > { %1060 = vmatpush3.bf16.msra.mxu0 %v1164_v19  ;;  %1099 = vmatpush3.bf16.msra.mxu1 %v1164_v19  ;;  %v1170_v25 = vld [vmem:[%s1368_s14 + $0x30] sm:$0xff]   ;;  %v1171_v26 = vld [vmem:[%s1368_s14 + $0x38] sm:$0xff]   ;;  %v404_v36 = vld [vmem:[#allocation2 + $0x40] sm:$0xff] }
  0x3e   : > { %1061 = vmatprep.subr.bf16.mxu0 %v1165_v20  ;;  %1092 = vmatprep.subr.bf16.mxu1 %v1165_v20  ;;  %v406_v34 = vld [vmem:[#allocation2 + $0x50] sm:$0xff]  ;;  %v399_v39 = vld [vmem:[#allocation2 + $0x18] sm:$0xff]  ;;  %v405_v46 = vld [vmem:[#allocation2 + $0x48] sm:$0xff] }
  0x3f   : > { %v407_v40 = vld [vmem:[#allocation2 + $0x58] sm:$0xff]  ;;  %v402_v57 = vld [vmem:[#allocation2 + $0x30] sm:$0xff]  ;;  %v400_v59 = vld [vmem:[#allocation2 + $0x20] sm:$0xff] }
  0x40   : > { %v410_v58 = vld [vmem:[#allocation2 + $0x70] sm:$0xff]  ;;  %v408_v60 = vld [vmem:[#allocation2 + $0x60] sm:$0xff]  ;;  %v403_v63 = vld [vmem:[#allocation2 + $0x38] sm:$0xff] }
  0x41   : > { %1062 = vmatpush3.bf16.msra.mxu0 %v1165_v20  ;;  %1100 = vmatpush3.bf16.msra.mxu1 %v1165_v20  ;;  %v411_v0 = vld [vmem:[#allocation2 + $0x78] sm:$0xff]  ;;  %v401_v5 = vld [vmem:[#allocation2 + $0x28] sm:$0xff] }
  0x42   : > { %1063 = vmatprep.subr.bf16.mxu0 %v1166_v21  ;;  %1093 = vmatprep.subr.bf16.mxu1 %v1166_v21  ;;  %v409_v6 = vld [vmem:[#allocation2 + $0x68] sm:$0xff] }
  0x45   : > { %1064 = vmatpush3.bf16.msra.mxu0 %v1166_v21  ;;  %1101 = vmatpush3.bf16.msra.mxu1 %v1166_v21 }
  0x46   : > { %1065 = vmatprep.subr.bf16.mxu0 %v1167_v22  ;;  %1094 = vmatprep.subr.bf16.mxu1 %v1167_v22 }
  0x49   : > { %1066 = vmatpush3.bf16.msra.mxu0 %v1167_v22  ;;  %1102 = vmatpush3.bf16.msra.mxu1 %v1167_v22 }
  0x4a   : > { %1067 = vmatprep.subr.bf16.mxu0 %v1168_v23  ;;  %1095 = vmatprep.subr.bf16.mxu1 %v1168_v23 }
  0x4d   : > { %1068 = vmatpush3.bf16.msra.mxu0 %v1168_v23  ;;  %1103 = vmatpush3.bf16.msra.mxu1 %v1168_v23 }
  0x4e   : > { %1069 = vmatprep.subr.bf16.mxu0 %v1169_v24  ;;  %1096 = vmatprep.subr.bf16.mxu1 %v1169_v24 }
  0x51   : > { %1070 = vmatpush3.bf16.msra.mxu0 %v1169_v24  ;;  %1104 = vmatpush3.bf16.msra.mxu1 %v1169_v24 }
  0x52   : > { %1071 = vmatprep.subr.bf16.mxu0 %v1170_v25  ;;  %1097 = vmatprep.subr.bf16.mxu1 %v1170_v25 }
  0x55   : > { %1072 = vmatpush3.bf16.msra.mxu0 %v1170_v25  ;;  %1105 = vmatpush3.bf16.msra.mxu1 %v1170_v25 }
  0x56   : > { %1073 = vmatprep.subr.bf16.mxu0 %v1171_v26  ;;  %1098 = vmatprep.subr.bf16.mxu1 %v1171_v26 }
  0x59   : > { %1074 = vmatpush3.bf16.msra.mxu0 %v1171_v26  ;;  %1106 = vmatpush3.bf16.msra.mxu1 %v1171_v26 }
  0x5c   : > { %1076 = vmatmul.mubr.bf16.vlgmr.msra.gmra.mrb[0].mxu0 %v1174_v27  ;;  %1084 = vmatmul.mubr.bf16.vlgmr.msra.gmra.mrb[0].mxu1 %v1175_v28 }
  0x5d   : > { %1079 = vmatprep.mubr.bf16.mxu0 %v1176_v29  ;;  %1087 = vmatprep.mubr.bf16.mxu1 %v1177_v30 }
  0x64   : > { %1080 = vmatmul.mubr.bf16.gmra.mrb[4].mxu0 %v1178_v31  ;;  %1088 = vmatmul.mubr.bf16.gmra.mrb[4].mxu1 %v1179_v32 }
 0x12f   : > { %v1077_v37 = vpop.f32.mrb[0].mxu0  ;;  %v1085_v38 = vpop.f32.mrb[0].mxu1 }
 0x130   : > { %v623_v41 = vadd.f32 %v1077_v37, %v398_v33  ;;  %v631_v42 = vadd.f32 %v1085_v38, %v406_v34  ;;  %v558_v43 = vpop.f32.mrb[1].mxu0  ;;  %v590_v44 = vpop.f32.mrb[1].mxu1 }
 0x131   : > { %v621_v47 = vadd.f32 %v558_v43, %v396_v35  ;;  %v629_v48 = vadd.f32 %v590_v44, %v404_v36  ;;  %v1078_v49 = vpop.f32.mrb[2].mxu0  ;;  %v1086_v50 = vpop.f32.mrb[2].mxu1 }
 0x132   : > { %639 = vst [vmem:[#allocation2 + $0x10] sm:$0xff] %v623_v41  ;;  %647 = vst [vmem:[#allocation2 + $0x50] sm:$0xff] %v631_v42  ;;  %v624_v51 = vadd.f32 %v1078_v49, %v399_v39  ;;  %v632_v52 = vadd.f32 %v1086_v50, %v407_v40  ;;  %v561_v53 = vpop.f32.mrb[3].mxu0  ;;  %v593_v54 = vpop.f32.mrb[3].mxu1  ;;  %v753_v40 = vld [vmem:[%s1347_s29] sm:$0xff] (!%p960_p12)  ;;  %v754_v41 = vld [vmem:[%s1347_s29 + $0x8] sm:$0xff] (!%p960_p12) }
 0x133   : > { %637 = vst [vmem:[#allocation2] sm:$0xff] %v621_v47  ;;  %645 = vst [vmem:[#allocation2 + $0x40] sm:$0xff] %v629_v48  ;;  %v622_v55 = vadd.f32 %v561_v53, %v397_v45  ;;  %v630_v56 = vadd.f32 %v593_v54, %v405_v46  ;;  %v755_v45 = vld [vmem:[%s1347_s29 + $0x10] sm:$0xff] (!%p960_p12)  ;;  %v756_v46 = vld [vmem:[%s1347_s29 + $0x18] sm:$0xff] (!%p960_p12) }
 0x134   : > { %640 = vst [vmem:[#allocation2 + $0x18] sm:$0xff] %v624_v51  ;;  %648 = vst [vmem:[#allocation2 + $0x58] sm:$0xff] %v632_v52  ;;  %v757_v47 = vld [vmem:[%s1347_s29 + $0x20] sm:$0xff] (!%p960_p12)  ;;  %v758_v51 = vld [vmem:[%s1347_s29 + $0x28] sm:$0xff] (!%p960_p12) }
 0x135   : > { %638 = vst [vmem:[#allocation2 + $0x8] sm:$0xff] %v622_v55  ;;  %646 = vst [vmem:[#allocation2 + $0x48] sm:$0xff] %v630_v56  ;;  %v759_v52 = vld [vmem:[%s1347_s29 + $0x30] sm:$0xff] (!%p960_p12)  ;;  %v760_v53 = vld [vmem:[%s1347_s29 + $0x38] sm:$0xff] (!%p960_p12) }
 0x137   : > { %v1081_v61 = vpop.f32.mrb[4].mxu0  ;;  %v1089_v62 = vpop.f32.mrb[4].mxu1  ;;  %656 = sbr.rel (%p960_p12) target bundleno = 331 (0x14b), region = 81 }
 0x138   : > { %v627_v1 = vadd.f32 %v1081_v61, %v402_v57  ;;  %v635_v2 = vadd.f32 %v1089_v62, %v410_v58  ;;  %v574_v3 = vpop.f32.mrb[5].mxu0  ;;  %v606_v4 = vpop.f32.mrb[5].mxu1  ;;  %v761_v57 = vld [vmem:[%s1347_s29 + $0x40] sm:$0xff] (!%p960_p12)  ;;  %v762_v58 = vld [vmem:[%s1347_s29 + $0x48] sm:$0xff] (!%p960_p12) }
 0x139   : > { %v625_v7 = vadd.f32 %v574_v3, %v400_v59  ;;  %v633_v8 = vadd.f32 %v606_v4, %v408_v60  ;;  %v1082_v9 = vpop.f32.mrb[6].mxu0  ;;  %v1090_v10 = vpop.f32.mrb[6].mxu1  ;;  %v659_v19 = vld [vmem:[#allocation2 + $0x10] sm:$0xff] (!%p960_p12) }
 0x13a   : > { %643 = vst [vmem:[#allocation2 + $0x30] sm:$0xff] %v627_v1  ;;  %651 = vst [vmem:[#allocation2 + $0x70] sm:$0xff] %v635_v2  ;;  %v628_v11 = vadd.f32 %v1082_v9, %v403_v63  ;;  %v636_v12 = vadd.f32 %v1090_v10, %v411_v0  ;;  %v577_v13 = vpop.f32.mrb[7].mxu0  ;;  %v609_v14 = vpop.f32.mrb[7].mxu1  ;;  %v657_v17 = vld [vmem:[#allocation2] sm:$0xff] (!%p960_p12)  ;;  %v667_v31 = vld [vmem:[#allocation2 + $0x50] sm:$0xff] (!%p960_p12)  ;;  %v771_v48 = vadd.f32 (!%p960_p12), %v755_v45, %v659_v19 }
 0x13b   : > { %641 = vst [vmem:[#allocation2 + $0x20] sm:$0xff] %v625_v7  ;;  %649 = vst [vmem:[#allocation2 + $0x60] sm:$0xff] %v633_v8  ;;  %v626_v15 = vadd.f32 %v577_v13, %v401_v5  ;;  %v634_v16 = vadd.f32 %v609_v14, %v409_v6  ;;  %v660_v21 = vld [vmem:[#allocation2 + $0x18] sm:$0xff] (!%p960_p12)  ;;  %v665_v28 = vld [vmem:[#allocation2 + $0x40] sm:$0xff] (!%p960_p12)  ;;  %v769_v43 = vadd.f32 (!%p960_p12), %v753_v40, %v657_v17 }
 0x13c   : > { %644 = vst [vmem:[#allocation2 + $0x38] sm:$0xff] %v628_v11  ;;  %652 = vst [vmem:[#allocation2 + $0x78] sm:$0xff] %v636_v12  ;;  %v658_v18 = vld [vmem:[#allocation2 + $0x8] sm:$0xff] (!%p960_p12)  ;;  %v1004_v24 = vpack.c.bf16 (!%p960_p12), %v660_v21, %v659_v19  ;;  %v668_v32 = vld [vmem:[#allocation2 + $0x58] sm:$0xff] (!%p960_p12)  ;;  %v772_v49 = vadd.f32 (!%p960_p12), %v756_v46, %v660_v21  ;;  %v777_v60 = vadd.f32 (!%p960_p12), %v761_v57, %v665_v28 }
 0x13d   : > { %642 = vst [vmem:[#allocation2 + $0x28] sm:$0xff] %v626_v15  ;;  %650 = vst [vmem:[#allocation2 + $0x68] sm:$0xff] %v634_v16  ;;  %v999_v20 = vpack.c.bf16 (!%p960_p12), %v658_v18, %v657_v17  ;;  %v666_v30 = vld [vmem:[#allocation2 + $0x48] sm:$0xff] (!%p960_p12)  ;;  %v1024_v34 = vpack.c.bf16 (!%p960_p12), %v668_v32, %v667_v31  ;;  %v770_v44 = vadd.f32 (!%p960_p12), %v754_v41, %v658_v18  ;;  %v763_v59 = vld [vmem:[%s1347_s29 + $0x50] sm:$0xff] (!%p960_p12) }
 0x13e   : > { %1036 = vst [vmem:[%s1352_s6 + $0x8] sm:$0xff] %v1004_v24   ;;  %v1019_v33 = vpack.c.bf16 %v666_v30, %v665_v28  ;;  %785 = vst [vmem:[%s1357_s15] sm:$0xff] %v769_v43  ;;  %v778_v61 = vadd.f32 %v762_v58, %v666_v30  ;;  %v779_v62 = vadd.f32 %v763_v59, %v667_v31  ;;  %v764_v63 = vld [vmem:[%s1347_s29 + $0x58] sm:$0xff]  ;;  %v765_v0 = vld [vmem:[%s1347_s29 + $0x60] sm:$0xff] }
 0x13f   : > { %1000 = vst [vmem:[%s1352_s6] sm:$0xff] %v999_v20   ;;  %1040 = vst [vmem:[%s1352_s6 + $0x28] sm:$0xff] %v1024_v34   ;;  %v766_v1 = vld [vmem:[%s1347_s29 + $0x68] sm:$0xff]  ;;  %v780_v2 = vadd.f32 %v764_v63, %v668_v32  ;;  %v767_v5 = vld [vmem:[%s1347_s29 + $0x70] sm:$0xff] }
 0x140   : > { %1039 = vst [vmem:[%s1352_s6 + $0x20] sm:$0xff] %v1019_v33   ;;  %786 = vst [vmem:[%s1357_s15 + $0x8] sm:$0xff] %v770_v44  ;;  %v768_v6 = vld [vmem:[%s1347_s29 + $0x78] sm:$0xff] }
 0x141   : > { %v663_v26 = vld [vmem:[#allocation2 + $0x30] sm:$0xff]  ;;  %787 = vst [vmem:[%s1357_s15 + $0x10] sm:$0xff] %v771_v48  ;;  %788 = vst [vmem:[%s1357_s15 + $0x18] sm:$0xff] %v772_v49 }
 0x142   : > { %v661_v22 = vld [vmem:[#allocation2 + $0x20] sm:$0xff]  ;;  %v671_v37 = vld [vmem:[#allocation2 + $0x70] sm:$0xff]  ;;  %v775_v55 = vadd.f32 %v759_v52, %v663_v26  ;;  %793 = vst [vmem:[%s1357_s15 + $0x40] sm:$0xff] %v777_v60  ;;  %794 = vst [vmem:[%s1357_s15 + $0x48] sm:$0xff] %v778_v61 }
 0x143   : > { %v664_v27 = vld [vmem:[#allocation2 + $0x38] sm:$0xff]  ;;  %v669_v35 = vld [vmem:[#allocation2 + $0x60] sm:$0xff]  ;;  %v773_v50 = vadd.f32 %v757_v47, %v661_v22  ;;  %795 = vst [vmem:[%s1357_s15 + $0x50] sm:$0xff] %v779_v62  ;;  %v783_v7 = vadd.f32 %v767_v5, %v671_v37  ;;  %796 = vst [vmem:[%s1357_s15 + $0x58] sm:$0xff] %v780_v2 }
 0x144   : > { %v662_v23 = vld [vmem:[#allocation2 + $0x28] sm:$0xff]  ;;  %v1014_v29 = vpack.c.bf16 %v664_v27, %v663_v26  ;;  %v672_v39 = vld [vmem:[#allocation2 + $0x78] sm:$0xff]  ;;  %v776_v56 = vadd.f32 %v760_v53, %v664_v27  ;;  %791 = vst [vmem:[%s1357_s15 + $0x30] sm:$0xff] %v775_v55  ;;  %v781_v3 = vadd.f32 %v765_v0, %v669_v35 }
 0x145   : > { %v1009_v25 = vpack.c.bf16 %v662_v23, %v661_v22  ;;  %v670_v36 = vld [vmem:[#allocation2 + $0x68] sm:$0xff]  ;;  %v1034_v42 = vpack.c.bf16 %v672_v39, %v671_v37  ;;  %v774_v54 = vadd.f32 %v758_v51, %v662_v23  ;;  %789 = vst [vmem:[%s1357_s15 + $0x20] sm:$0xff] %v773_v50  ;;  %v784_v8 = vadd.f32 %v768_v6, %v672_v39 }
 0x146   : > { %1038 = vst [vmem:[%s1352_s6 + $0x18] sm:$0xff] %v1014_v29   ;;  %v1029_v38 = vpack.c.bf16 %v670_v36, %v669_v35  ;;  %792 = vst [vmem:[%s1357_s15 + $0x38] sm:$0xff] %v776_v56  ;;  %v782_v4 = vadd.f32 %v766_v1, %v670_v36 }
 0x147   : > { %1037 = vst [vmem:[%s1352_s6 + $0x10] sm:$0xff] %v1009_v25   ;;  %1042 = vst [vmem:[%s1352_s6 + $0x38] sm:$0xff] %v1034_v42  }
 0x148   : > { %1041 = vst [vmem:[%s1352_s6 + $0x30] sm:$0xff] %v1029_v38   ;;  %790 = vst [vmem:[%s1357_s15 + $0x28] sm:$0xff] %v774_v54 }
 0x149   : > { %797 = vst [vmem:[%s1357_s15 + $0x60] sm:$0xff] %v781_v3  ;;  %798 = vst [vmem:[%s1357_s15 + $0x68] sm:$0xff] %v782_v4 }
 0x14a   : > { %799 = vst [vmem:[%s1357_s15 + $0x70] sm:$0xff] %v783_v7  ;;  %800 = vst [vmem:[%s1357_s15 + $0x78] sm:$0xff] %v784_v8 }
 0x14b PF: > { %s15_s21 = sadd.s32 1, %s1234_s21   ;;  %s1451_s15 = smov %s1214_s16 }
 0x14c   : > { %p12_p13 = scmp.ge.s32.totalorder %s15_s21, 6   ;;  %s1452_s16 = smov %s1313_s28 }
 0x14d   : > { %s1453_s17 = smov %s1226_s19  ;;  %s1454_s18 = smov %s1230_s20 }
 0x14e   : > { %s1455_s19 = smov %s1458_s22  ;;  %s1456_s20 = smov %s1462_s23 }
 0x14f   :  { %14 = sbr.rel (!%p12_p13) target bundleno = 4 (0x4), region = 132 }

// kernel: lightgcn_forward.12
= control target key start
LH: loop header
LB: loop body
LE: loop exit
PB: predicated region body
PF: predicated region fallthrough
CT: control target
= control target key end

     0   :  { %v217_v1 = vmov 0.0   ;;  %vm218_vm0 = vmmov 0   ;;  %v219_v3 = vmov 0   ;;  %s283_s0 = inlined_call_operand.vmem [shape: bf16[8,128], index: 0, kind: input, shape index: {}]   ;;  %s284_s1 = inlined_call_operand.vmem [shape: f32[8,1], index: 1, kind: input, shape index: {}]   ;;  %s285_s2 = inlined_call_operand.vmem [shape: bf16[128,128], index: 2, kind: input, shape index: {}]   ;;  %s286_s3 = inlined_call_operand.hbm [shape: f32[8,128], index: 3, kind: output, shape index: {}]  }
   0x1   :  { %v185_v0 = vld [vmem:[%s285_s2] sm:$0xff]   ;;  %160 = vmatprep.subr.bf16.mxu0 %v217_v1  ;;  %v186_v2 = vld [vmem:[%s285_s2 + $0x8] sm:$0xff]   ;;  %176 = vmatprep.mubr.msk.bf16.mxu0 %vm218_vm0, %v217_v1  ;;  %v187_v4 = vld [vmem:[%s285_s2 + $0x10] sm:$0xff]  }
   0x2   :  { %161 = vmatpush3.bf16.msra.mxu0 %v185_v0  ;;  %184 = vset.pattern.permute.xlu0 %v219_v3  ;;  %v121_v5 = vld [vmem:[%s284_s1] sm:$0xff] }
   0x3   :  { %162 = vmatprep.subr.bf16.mxu0 %v217_v1 }
   0x6   :  { %163 = vmatpush3.bf16.msra.mxu0 %v186_v2 }
   0x7   :  { %164 = vmatprep.subr.bf16.mxu0 %v217_v1 }
   0x8   :  { %8 = vsyncpa [#allocation3], 0  ;;  %124 = vperm.xlu0 %184, %v121_v5   ;;  %v188_v6 = vld [vmem:[%s285_s2 + $0x18] sm:$0xff]   ;;  %v189_v7 = vld [vmem:[%s285_s2 + $0x20] sm:$0xff]   ;;  %s220_s4 = smov [#allocation2]  }
   0x9   :  { %v190_v8 = vld [vmem:[%s285_s2 + $0x28] sm:$0xff]   ;;  %v191_v9 = vld [vmem:[%s285_s2 + $0x30] sm:$0xff]   ;;  %v192_v10 = vld [vmem:[%s285_s2 + $0x38] sm:$0xff]   ;;  %s135_s5 = sshll.u32 %s220_s4, 4  ;;  %s136_s5 = int_to_ptr.vmem [resolvable:$true] %s135_s5 }
   0xa   :  { %165 = vmatpush3.bf16.msra.mxu0 %v187_v4  ;;  %v16_v11 = vld [vmem:[%s283_s0] sm:$0xf]  ;;  %s193_s6 = scalar_lea.vmem %s136_s5, 128  ;;  %p198_p1 = scmp.lt.s32.totalorder %s136_s5, %s136_s5 }
   0xb   :  { %166 = vmatprep.subr.bf16.mxu0 %v217_v1  ;;  %p194_p0 = scmp.ne.s32.totalorder %s136_s5, %s193_s6  ;;  %p199_p2 = scmp.lt.s32.totalorder %s193_s6, %s193_s6 }
   0xd   :  { %p200_p3 = por %p199_p2, %p198_p1 }
   0xe   :  { %167 = vmatpush3.bf16.msra.mxu0 %v188_v6 }
   0xf   :  { %168 = vmatprep.subr.bf16.mxu0 %v217_v1  ;;  %p201_p4 = pnand %p200_p3, %p194_p0 }
  0x12   :  { %169 = vmatpush3.bf16.msra.mxu0 %v189_v7 }
  0x13   :  { %170 = vmatprep.subr.bf16.mxu0 %v217_v1 }
  0x16   :  { %171 = vmatpush3.bf16.msra.mxu0 %v190_v8 }
  0x17   :  { %172 = vmatprep.subr.bf16.mxu0 %v217_v1 }
  0x1a   :  { %173 = vmatpush3.bf16.msra.mxu0 %v191_v9 }
  0x1b   :  { %174 = vmatprep.subr.bf16.mxu0 %v217_v1 }
  0x1e   :  { %175 = vmatpush3.bf16.msra.mxu0 %v192_v10 }
  0x21   :  { %177 = vmatmul.mubr.bf16.vlgmr.msra.gmra.mrb[0].mxu0 %v16_v11 }
  0x87   :  { %v125_v12 = vpop.permute.xlu0 %124 }
  0xf4   :  { %v115_v13 = vpop.f32.mrb[0].mxu0 }
  0xf5   :  { %v127_v14 = vsub.f32 %v115_v13, %v125_v12  ;;  %v178_v15 = vpop.f32.mrb[1].mxu0 }
  0xf6   :  { %v118_v16 = vpop.f32.mrb[2].mxu0 }
  0xf7   :  { %128 = vst [vmem:[#allocation2] sm:$0xff] %v127_v14  ;;  %v179_v17 = vpop.f32.mrb[3].mxu0 }
  0xf8   :  { %204 = shalt.err (!%p201_p4)
}
  0xf9   :  { %s205_s7 = scalar_lea.hbm %s286_s3, 128 }
  0xfa   :  { %p206_p5 = scmp.ne.s32.totalorder %s286_s3, %s205_s7  ;;  %p209_p6 = scmp.lt.u32.totalorder %s205_s7, %s286_s3 }
  0xfc   :  { %p211_p7 = pnand %p209_p6, %p206_p5 }
  0xfe   :  { %214 = shalt.err (!%p211_p7)
}
  0xff   :  { %138 = dma.vmem_to_hbm [thread:$0]  %s136_s5, 128, %s286_s3, [#allocation3]  }
 0x100   :  { %215 = dma.done.wait [#allocation3], 128  }
 0x101   :  { %216 = vsyncadd [#allocation3], 4294967168 }
 0x102   :  { %142 = vsyncpa [#allocation3], 1 }

// kernel: lightgcn_forward.11
= control target key start
LH: loop header
LB: loop body
LE: loop exit
PB: predicated region body
PF: predicated region fallthrough
CT: control target
= control target key end

     0   :  { %s1203_s21 = smov 0   ;;  %s1570_s0 = inlined_call_operand.vmem [shape: f32[256,128], index: 0, kind: input, shape index: {}]   ;;  %s1571_s1 = inlined_call_operand.vmem [shape: bf16[128,64], index: 1, kind: input, shape index: {}]   ;;  %s1572_s2 = inlined_call_operand.vmem [shape: f32[1,64], index: 2, kind: input, shape index: {}]   ;;  %s1573_s3 = inlined_call_operand.vmem [shape: bf16[64,128], index: 3, kind: input, shape index: {}]   ;;  %s1574_s4 = inlined_call_operand.vmem [shape: f32[1,128], index: 4, kind: input, shape index: {}]   ;;  %s1575_s5 = inlined_call_operand.vmem [shape: f32[256,128], index: 5, kind: output, shape index: {0}]   ;;  %s1576_s6 = inlined_call_operand.vmem [shape: f32[2,1,128], index: 6, kind: output, shape index: {1}]  }
   0x1 LB: > { %s1209_s22 = sadd.s32 4294967295, %s1165_s21   ;;  %p976_p0 = scmp.ge.s32.totalorder %s1165_s21, 1  ;;  %s1165_s21 = sphi %s1203_s21, %s17_s21  }
   0x2   : > { %p216_p1 = scmp.lt.s32.totalorder %s1165_s21, 3 }
   0x4   : > { %p217_p2 = pnand %p976_p0, %p216_p1 }
   0x5   : > { %v1115_v0 = vld [vmem:[%s1571_s1] sm:$0xff] (!%p217_p2)   ;;  %s977_s25 = sshll.u32 (!%p217_p2), %s1209_s22, 4  ;;  %v1116_v1 = vld [vmem:[%s1571_s1 + $0x8] sm:$0xff] (!%p217_p2)   ;;  %v1117_v2 = vld [vmem:[%s1571_s1 + $0x10] sm:$0xff] (!%p217_p2)   ;;  %vm504_vm0 = vcmask (!%p217_p2), 523264   ;;  %s1003_s10 = sshll.u32 (!%p217_p2), %s1209_s22, 7 }
   0x6   : > { %220 = sbr.rel (%p217_p2) target bundleno = 663 (0x297), region = 40  ;;  %p250_p3 = scmp.lt.s32.totalorder (!%p217_p2), %s977_s25, 31  ;;  %1050 = vmatprep.subr.bf16.mxu0 (!%p217_p2), %v1115_v0  ;;  %v1118_v3 = vld [vmem:[%s1571_s1 + $0x18] sm:$0xff] (!%p217_p2)   ;;  %v1119_v7 = vld [vmem:[%s1571_s1 + $0x20] sm:$0xff] (!%p217_p2)   ;;  %v1124_v9 = vld [vmem:[%s1573_s3 + $0x8] sm:$0xff] (!%p217_p2)  }
   0x7   : > { %1051 = vmatpush3.bf16.msra.mxu0 (!%p217_p2), %v1115_v0  ;;  %v1123_v8 = vld [vmem:[%s1573_s3] sm:$0xff] (!%p217_p2)   ;;  %v1120_v10 = vld [vmem:[%s1571_s1 + $0x28] sm:$0xff] (!%p217_p2)   ;;  %v1121_v11 = vld [vmem:[%s1571_s1 + $0x30] sm:$0xff] (!%p217_p2)   ;;  %p261_p4 = scmp.lt.s32.totalorder (!%p217_p2), %s1209_s22, 1 }
   0x8   : > { %1052 = vmatprep.subr.bf16.mxu0 (!%p217_p2), %v1116_v1  ;;  %1082 = vmatprep.subr.bf16.mxu1 (!%p217_p2), %v1123_v8  ;;  %v1122_v12 = vld [vmem:[%s1571_s1 + $0x38] sm:$0xff] (!%p217_p2)   ;;  %v1125_v34 = vld [vmem:[%s1573_s3 + $0x10] sm:$0xff] (!%p217_p2)   ;;  %v981_v37 = vld [vmem:[%s1572_s2] ss:$0 sm:$0xff] (!%p217_p2) }
   0x9   : > { %1083 = vmatpush3.bf16.msra.mxu1 (!%p217_p2), %v1123_v8  ;;  %v1126_v35 = vld [vmem:[%s1573_s3 + $0x18] sm:$0xff] (!%p217_p2)  }
   0xa   : > { %1084 = vmatprep.subr.bf16.mxu1 (!%p217_p2), %v1124_v9 }
   0xb   : > { %1053 = vmatpush3.bf16.msra.mxu0 (!%p217_p2), %v1116_v1 }
   0xc   : > { %1054 = vmatprep.subr.bf16.mxu0 (!%p217_p2), %v1117_v2 }
   0xd   : > { %s1578_s25 = smov (!%p250_p3, %s977_s25), 31  ;;  %1085 = vmatpush3.bf16.msra.mxu1 %v1124_v9  ;;  %s1580_s22 = smov (!%p261_p4, %s1209_s22), 1 }
   0xe   : > { %s978_s30 = sshll.u32 %s1578_s25, 3  ;;  %1086 = vmatprep.subr.bf16.mxu1 %v1125_v34  ;;  %s263_s15 = scalar_lea.vmem %s1576_s6, %s1580_s22 }
   0xf   : > { %s1231_s9 = scalar_lea.vmem %s1570_s0, %s978_s30  ;;  %1055 = vmatpush3.bf16.msra.mxu0 %v1117_v2  ;;  %s1533_s17 = scalar_lea.vmem %s1575_s5, %s978_s30 }
  0x10   : > { %v1237_v4 = vld [vmem:[%s1231_s9] sm:$0xff]  ;;  %v1240_v5 = vld [vmem:[%s1231_s9 + $0x8] sm:$0xff]  ;;  %1056 = vmatprep.subr.bf16.mxu0 %v1118_v3  ;;  %v1263_v13 = vld [vmem:[%s1231_s9 + $0x10] sm:$0xff] }
  0x11   : > { %v281_v6 = vpack.c.bf16 %v1240_v5, %v1237_v4  ;;  %v1266_v14 = vld [vmem:[%s1231_s9 + $0x18] sm:$0xff]  ;;  %v1269_v15 = vld [vmem:[%s1231_s9 + $0x20] sm:$0xff]  ;;  %v1272_v16 = vld [vmem:[%s1231_s9 + $0x28] sm:$0xff]  ;;  %1087 = vmatpush3.bf16.msra.mxu1 %v1125_v34 }
  0x12   : > { %v282_v17 = vpack.c.bf16 %v1266_v14, %v1263_v13  ;;  %v283_v18 = vpack.c.bf16 %v1272_v16, %v1269_v15  ;;  %v1279_v19 = vld [vmem:[%s1231_s9 + $0x30] sm:$0xff]  ;;  %v1282_v20 = vld [vmem:[%s1231_s9 + $0x38] sm:$0xff]  ;;  %v1285_v21 = vld [vmem:[%s1231_s9 + $0x40] sm:$0xff]  ;;  %1088 = vmatprep.subr.bf16.mxu1 %v1126_v35 }
  0x13   : > { %1066 = vmatprep.mubr.bf16.mxu0 %v281_v6  ;;  %1057 = vmatpush3.bf16.msra.mxu0 %v1118_v3  ;;  %v1288_v22 = vld [vmem:[%s1231_s9 + $0x48] sm:$0xff]  ;;  %v284_v23 = vpack.c.bf16 %v1282_v20, %v1279_v19  ;;  %v1295_v25 = vld [vmem:[%s1231_s9 + $0x50] sm:$0xff]  ;;  %v1298_v26 = vld [vmem:[%s1231_s9 + $0x58] sm:$0xff] }
  0x14   : > { %1058 = vmatprep.subr.bf16.mxu0 %v1119_v7  ;;  %v285_v24 = vpack.c.bf16 %v1288_v22, %v1285_v21  ;;  %v1301_v27 = vld [vmem:[%s1231_s9 + $0x60] sm:$0xff]  ;;  %v1304_v28 = vld [vmem:[%s1231_s9 + $0x68] sm:$0xff]  ;;  %v286_v29 = vpack.c.bf16 %v1298_v26, %v1295_v25  ;;  %v1311_v31 = vld [vmem:[%s1231_s9 + $0x70] sm:$0xff] }
  0x15   : > { %v287_v30 = vpack.c.bf16 %v1304_v28, %v1301_v27  ;;  %v1314_v32 = vld [vmem:[%s1231_s9 + $0x78] sm:$0xff]  ;;  %1089 = vmatpush3.bf16.msra.mxu1 %v1126_v35 }
  0x16   : > { %v288_v33 = vpack.c.bf16 %v1314_v32, %v1311_v31 }
  0x17   : > { %1059 = vmatpush3.bf16.msra.mxu0 %v1119_v7 }
  0x18   : > { %1060 = vmatprep.subr.bf16.mxu0 %v1120_v10 }
  0x1b   : > { %1061 = vmatpush3.bf16.msra.mxu0 %v1120_v10 }
  0x1c   : > { %1062 = vmatprep.subr.bf16.mxu0 %v1121_v11 }
  0x1f   : > { %1063 = vmatpush3.bf16.msra.mxu0 %v1121_v11 }
  0x20   : > { %1064 = vmatprep.subr.bf16.mxu0 %v1122_v12 }
  0x23   : > { %1065 = vmatpush3.bf16.msra.mxu0 %v1122_v12 }
  0x26   : > { %1067 = vmatmul.mubr.bf16.vlgmr.msra.gmra.mrb[0].mxu0 %v282_v17 }
  0x27   : > { %1070 = vmatprep.mubr.bf16.mxu0 %v283_v18 }
  0x2e   : > { %1071 = vmatmul.mubr.bf16.gmra.mrb[4].mxu0 %v284_v23  ;;  %v642_v23 = vlaneseq }
  0x2f   : > { %1074 = vmatprep.mubr.bf16.mxu0 %v285_v24 }
  0x30   : > { %v1335_v24 = vshrl.u32 %v642_v23, 7 }
  0x32   : > { %v644_v34 = vadd.s32 8, %v1335_v24 }
  0x36   : > { %1075 = vmatmul.mubr.bf16.gmra.mrb[8].mxu0 %v286_v29  ;;  %v645_v29 = vadd.s32 16, %v1335_v24 }
  0x37   : > { %1078 = vmatprep.mubr.bf16.mxu0 %v287_v30  ;;  %v1339_v30 = vstv %s1003_s10 }
  0x38   : > { %v663_v35 = vadd.s32 %v1339_v30, %v645_v29 }
  0x3a   : > { %vm679_vm1 = vcmp.lt.s32.totalorder %v663_v35, 240 }
  0x3e   : > { %1079 = vmatmul.mubr.bf16.gmra.mrb[12].mxu0 %v288_v33  ;;  %v646_v33 = vadd.s32 24, %v1335_v24 }
  0xf9   : > { %v1068_v36 = vpop.f32.mrb[0].mxu0 }
  0xfa   : > { %v394_v38 = vpop.f32.mrb[1].mxu0  ;;  %v403_v40 = vadd.f32 %v1068_v36, %v981_v37  ;;  %v661_v36 = vadd.s32 %v1339_v30, %v1335_v24 }
  0xfb   : > { %v1069_v39 = vpop.f32.mrb[2].mxu0  ;;  %v395_v43 = vadd.f32 %v981_v37, %v394_v38  ;;  %v662_v38 = vadd.s32 %v1339_v30, %v644_v34 }
  0xfc   : > { %v406_v41 = vadd.f32 %v1069_v39, %v981_v37  ;;  %v397_v42 = vpop.f32.mrb[3].mxu0  ;;  %v649_v39 = vadd.s32 48, %v1335_v24  ;;  %vm677_vm2 = vcmp.lt.s32.totalorder %v661_v36, 240 }
  0xfd   : > { %v398_v44 = vadd.f32 %v981_v37, %v397_v42  ;;  %v648_v42 = vadd.s32 40, %v1335_v24  ;;  %vm678_vm4 = vcmp.lt.s32.totalorder %v662_v38, 240 }
  0xfe   : > { %v458_v45 = vpack.c.bf16 %v406_v41, %v403_v40  ;;  %v647_v40 = vadd.s32 32, %v1335_v24  ;;  %v650_v41 = vadd.s32 56, %v1335_v24 }
  0xff   : > { %v457_v46 = vpack.c.bf16 %v398_v44, %v395_v43  ;;  %v653_v43 = vadd.s32 80, %v1335_v24  ;;  %v1356_v44 = vld [vmem:[%s1574_s4] ss:$0 sm:$0xff] }
 0x101   : > { %v1072_v47 = vpop.f32.mrb[4].mxu0  ;;  %1090 = vmatprep.mubr.msk.bf16.mxu1 %vm504_vm0, %v457_v46  ;;  %v665_v46 = vadd.s32 %v1339_v30, %v647_v40 }
 0x102   : > { %v410_v48 = vpop.f32.mrb[5].mxu0  ;;  %1091 = vmatmul.mubr.msk.bf16.vlgmr.msra.gmra.mrb[0].mxu1 %vm504_vm0, %v458_v45  ;;  %v419_v50 = vadd.f32 %v1072_v47, %v981_v37  ;;  %v667_v45 = vadd.s32 %v1339_v30, %v649_v39  ;;  %v1167_v47 = vmov 0.0  }
 0x103   : > { %v1073_v49 = vpop.f32.mrb[6].mxu0  ;;  %v411_v53 = vadd.f32 %v981_v37, %v410_v48  ;;  %v1006_v48 = vsel %vm679_vm1, 1.0, %v1167_v47  ;;  %vm681_vm6 = vcmp.lt.s32.totalorder %v665_v46, 240 }
 0x104   : > { %v422_v51 = vadd.f32 %v1073_v49, %v981_v37  ;;  %v413_v52 = vpop.f32.mrb[7].mxu0  ;;  %v668_v49 = vadd.s32 %v1339_v30, %v650_v41  ;;  %vm683_vm5 = vcmp.lt.s32.totalorder %v667_v45, 240 }
 0x105   : > { %v414_v54 = vadd.f32 %v981_v37, %v413_v52 }
 0x106   : > { %v460_v55 = vpack.c.bf16 %v422_v51, %v419_v50  ;;  %v1004_v51 = vsel %vm677_vm2, 1.0, %v1167_v47  ;;  %vm684_vm7 = vcmp.lt.s32.totalorder %v668_v49, 240  ;;  %v657_v49 = vadd.s32 112, %v1335_v24 }
 0x107   : > { %v459_v56 = vpack.c.bf16 %v414_v54, %v411_v53  ;;  %v1005_v53 = vsel %vm678_vm4, 1.0, %v1167_v47  ;;  %v666_v54 = vadd.s32 %v1339_v30, %v648_v42  ;;  %v1011_v23 = vsel %vm684_vm7, 1.0, %v1167_v47 }
 0x109   : > { %v1076_v57 = vpop.f32.mrb[8].mxu0  ;;  %1094 = vmatprep.mubr.msk.bf16.mxu1 %vm504_vm0, %v459_v56  ;;  %vm682_vm8 = vcmp.lt.s32.totalorder %v666_v54, 240 }
 0x10a   : > { %v426_v58 = vpop.f32.mrb[9].mxu0  ;;  %1095 = vmatmul.mubr.msk.bf16.gmra.mrb[4].mxu1 %vm504_vm0, %v460_v55  ;;  %v435_v60 = vadd.f32 %v1076_v57, %v981_v37  ;;  %v671_v57 = vadd.s32 %v1339_v30, %v653_v43  ;;  %v1009_v34 = vsel %vm682_vm8, 1.0, %v1167_v47 }
 0x10b   : > { %v1077_v59 = vpop.f32.mrb[10].mxu0  ;;  %v427_v63 = vadd.f32 %v981_v37, %v426_v58  ;;  %v651_v58 = vadd.s32 64, %v1335_v24 }
 0x10c   : > { %v438_v61 = vadd.f32 %v1077_v59, %v981_v37  ;;  %v429_v62 = vpop.f32.mrb[11].mxu0  ;;  %v654_v59 = vadd.s32 88, %v1335_v24  ;;  %vm687_vm9 = vcmp.lt.s32.totalorder %v671_v57, 240 }
 0x10d   : > { %v430_v0 = vadd.f32 %v981_v37, %v429_v62  ;;  %v652_v62 = vadd.s32 72, %v1335_v24  ;;  %v1411_v35 = vsel %vm687_vm9, 1.0, %v1167_v47 }
 0x10e   : > { %v462_v1 = vpack.c.bf16 %v438_v61, %v435_v60 }
 0x10f   : > { %v461_v2 = vpack.c.bf16 %v430_v0, %v427_v63 }
 0x111   : > { %v1080_v3 = vpop.f32.mrb[12].mxu0  ;;  %1098 = vmatprep.mubr.msk.bf16.mxu1 %vm504_vm0, %v461_v2 }
 0x112   : > { %v442_v6 = vpop.f32.mrb[13].mxu0  ;;  %1099 = vmatmul.mubr.msk.bf16.gmra.mrb[8].mxu1 %vm504_vm0, %v462_v1  ;;  %v451_v8 = vadd.f32 %v1080_v3, %v981_v37 }
 0x113   : > { %v1081_v7 = vpop.f32.mrb[14].mxu0  ;;  %v443_v11 = vadd.f32 %v981_v37, %v442_v6 }
 0x114   : > { %v454_v9 = vadd.f32 %v1081_v7, %v981_v37  ;;  %v445_v10 = vpop.f32.mrb[15].mxu0 }
 0x115   : > { %v446_v12 = vadd.f32 %v981_v37, %v445_v10  ;;  %v664_v37 = vadd.s32 %v1339_v30, %v646_v33 }
 0x116   : > { %v464_v17 = vpack.c.bf16 %v454_v9, %v451_v8  ;;  %v669_v8 = vadd.s32 %v1339_v30, %v651_v58  ;;  %v672_v9 = vadd.s32 %v1339_v30, %v654_v59  ;;  %v655_v58 = vadd.s32 96, %v1335_v24 }
 0x117   : > { %v463_v18 = vpack.c.bf16 %v446_v12, %v443_v11  ;;  %vm680_vm3 = vcmp.lt.s32.totalorder %v664_v37, 240  ;;  %v1010_v11 = vsel %vm683_vm5, 1.0, %v1167_v47  ;;  %v670_v12 = vadd.s32 %v1339_v30, %v652_v62 }
 0x118   : > { %v1007_v52 = vsel %vm680_vm3, 1.0, %v1167_v47  ;;  %vm685_vm10 = vcmp.lt.s32.totalorder %v669_v8, 240  ;;  %vm688_vm11 = vcmp.lt.s32.totalorder %v672_v9, 240 }
 0x119   : > { %1102 = vmatprep.mubr.msk.bf16.mxu1 %vm504_vm0, %v463_v18  ;;  %v1008_v18 = vsel %vm681_vm6, 1.0, %v1167_v47  ;;  %vm686_vm12 = vcmp.lt.s32.totalorder %v670_v12, 240  ;;  %v1012_v57 = vsel %vm685_vm10, 1.0, %v1167_v47  ;;  %v1015_v62 = vsel %vm688_vm11, 1.0, %v1167_v47 }
 0x11a   : > { %1103 = vmatmul.mubr.msk.bf16.gmra.mrb[12].mxu1 %vm504_vm0, %v464_v17  ;;  %v656_v12 = vadd.s32 104, %v1335_v24 }
 0x1d5   : > { %v1092_v50 = vpop.f32.mrb[0].mxu1 }
 0x1d6   : > { %v1367_v55 = vadd.f32 %v1092_v50, %v1356_v44  ;;  %v563_v56 = vpop.f32.mrb[1].mxu1 }
 0x1d7   : > { %v1373_v60 = vadd.f32 %v1356_v44, %v563_v56  ;;  %v1093_v61 = vpop.f32.mrb[2].mxu1 }
 0x1d8   : > { %v628_v63 = vsub.f32 %v1367_v55, %v1263_v13  ;;  %v1379_v0 = vadd.f32 %v1093_v61, %v1356_v44  ;;  %v566_v1 = vpop.f32.mrb[3].mxu1  ;;  %v781_v2 = vmul.f32 %v1367_v55, %v1367_v55 }
 0x1d9   : > { %v626_v3 = vsub.f32 %v1373_v60, %v1237_v4  ;;  %v1386_v6 = vadd.f32 %v1356_v44, %v566_v1  ;;  %v779_v7 = vmul.f32 %v1373_v60, %v1373_v60  ;;  %v1013_v1 = vsel %vm686_vm12, 1.0, %v1167_v47 }
 0x1da   : > { %v629_v13 = vsub.f32 %v1379_v0, %v1266_v14  ;;  %799 = vadd.xlane.f32.xlu1 %v781_v2  ;;  %v727_v17 = vmul.f32 %v1006_v48, %v628_v63  ;;  %v782_v14 = vmul.f32 %v1379_v0, %v1379_v0  ;;  %v1448_v2 = vadd.s32 %v1339_v30, %v657_v49 }
 0x1db   : > { %v725_v10 = vmul.f32 %v1004_v51, %v626_v3  ;;  %v627_v4 = vsub.f32 %v1386_v6, %v1240_v5  ;;  %795 = vadd.xlane.f32.xlu0 %v779_v7  ;;  %v780_v5 = vmul.f32 %v1386_v6, %v1386_v6 }
 0x1dc   : > { %v728_v36 = vmul.f32 %v1007_v52, %v629_v13  ;;  %v743_v43 = vmul.f32 %v727_v17, %v727_v17  ;;  %vm691_vm14 = vcmp.lt.s32.totalorder %v1448_v2, 240 }
 0x1dd   : > { %v726_v29 = vmul.f32 %v1005_v53, %v627_v4  ;;  %v1096_v33 = vpop.f32.mrb[4].mxu1  ;;  %v741_v39 = vmul.f32 %v725_v10, %v725_v10  ;;  %v673_v4 = vadd.s32 %v1339_v30, %v655_v58 }
 0x1de   : > { %v1414_v37 = vadd.f32 %v1096_v33, %v1356_v44  ;;  %801 = vadd.xlane.f32.xlu1 %v782_v14  ;;  %v579_v38 = vpop.f32.mrb[5].mxu1  ;;  %v744_v54 = vmul.f32 %v728_v36, %v728_v36 }
 0x1df   : > { %v742_v40 = vmul.f32 %v726_v29, %v726_v29  ;;  %v1417_v41 = vadd.f32 %v1356_v44, %v579_v38  ;;  %v1097_v42 = vpop.f32.mrb[6].mxu1  ;;  %797 = vadd.xlane.f32.xlu0 %v780_v5  ;;  %v658_v38 = vadd.s32 120, %v1335_v24  ;;  %vm689_vm13 = vcmp.lt.s32.totalorder %v673_v4, 240 }
 0x1e0   : > { %v1420_v45 = vadd.f32 %v1097_v42, %v1356_v44  ;;  %v582_v46 = vpop.f32.mrb[7].mxu1  ;;  %v785_v48 = vmul.f32 %v1414_v37, %v1414_v37  ;;  %v632_v51 = vsub.f32 %v1414_v37, %v1279_v19 }
 0x1e1   : > { %v757_v50 = vadd.f32 %v742_v40, %v741_v39  ;;  %v630_v52 = vsub.f32 %v1417_v41, %v1269_v15  ;;  %v1430_v53 = vadd.f32 %v1356_v44, %v582_v46  ;;  %v783_v63 = vmul.f32 %v1417_v41, %v1417_v41 }
 0x1e2   : > { %v786_v56 = vmul.f32 %v1420_v45, %v1420_v45  ;;  %v633_v19 = vsub.f32 %v1420_v45, %v1282_v20  ;;  %v731_v3 = vmul.f32 %v1010_v11, %v632_v51  ;;  %v674_v46 = vadd.s32 %v1339_v30, %v656_v12 }
 0x1e3   : > { %v758_v59 = vadd.f32 %v757_v50, %v743_v43  ;;  %v729_v61 = vmul.f32 %v1008_v18, %v630_v52  ;;  %v631_v15 = vsub.f32 %v1430_v53, %v1272_v16  ;;  %807 = vadd.xlane.f32.xlu0 %v785_v48  ;;  %v784_v9 = vmul.f32 %v1430_v53, %v1430_v53 }
 0x1e4   : > { %809 = vadd.xlane.f32.xlu1 %v786_v56  ;;  %v732_v14 = vmul.f32 %v1011_v23, %v633_v19  ;;  %v747_v23 = vmul.f32 %v731_v3, %v731_v3  ;;  %vm690_vm15 = vcmp.lt.s32.totalorder %v674_v46, 240 }
 0x1e5   : > { %v745_v7 = vmul.f32 %v729_v61, %v729_v61  ;;  %v759_v20 = vadd.f32 %v758_v59, %v744_v54  ;;  %v730_v13 = vmul.f32 %v1009_v34, %v631_v15  ;;  %v1100_v8 = vpop.f32.mrb[8].mxu1  ;;  %v1017_v12 = vsel %vm690_vm15, 1.0, %v1167_v47 }
 0x1e6   : > { %v1451_v16 = vadd.f32 %v1100_v8, %v1356_v44  ;;  %v595_v10 = vpop.f32.mrb[9].mxu1  ;;  %v748_v48 = vmul.f32 %v732_v14, %v732_v14 }
 0x1e7   : > { %v760_v17 = vadd.f32 %v759_v20, %v745_v7  ;;  %v746_v18 = vmul.f32 %v730_v13, %v730_v13  ;;  %v1458_v11 = vadd.f32 %v1356_v44, %v595_v10  ;;  %v1101_v29 = vpop.f32.mrb[10].mxu1  ;;  %803 = vadd.xlane.f32.xlu0 %v783_v63 }
 0x1e8   : > { %v636_v33 = vsub.f32 %v1451_v16, %v1295_v25  ;;  %v1463_v5 = vadd.f32 %v1101_v29, %v1356_v44  ;;  %v598_v34 = vpop.f32.mrb[11].mxu1  ;;  %805 = vadd.xlane.f32.xlu1 %v784_v9  ;;  %v789_v36 = vmul.f32 %v1451_v16, %v1451_v16 }
 0x1e9   : > { %v761_v39 = vadd.f32 %v760_v17, %v746_v18  ;;  %v634_v40 = vsub.f32 %v1458_v11, %v1285_v21  ;;  %v1471_v42 = vadd.f32 %v1356_v44, %v598_v34  ;;  %v787_v58 = vmul.f32 %v1458_v11, %v1458_v11 }
 0x1ea   : > { %v637_v25 = vsub.f32 %v1463_v5, %v1298_v26  ;;  %v790_v43 = vmul.f32 %v1463_v5, %v1463_v5  ;;  %v735_v21 = vmul.f32 %v1411_v35, %v636_v33  ;;  %v676_v26 = vadd.s32 %v1339_v30, %v658_v38 }
 0x1eb   : > { %v762_v49 = vadd.f32 %v761_v39, %v747_v23  ;;  %v733_v24 = vmul.f32 %v1012_v57, %v634_v40  ;;  %v635_v50 = vsub.f32 %v1471_v42, %v1288_v22  ;;  %815 = vadd.xlane.f32.xlu0 %v789_v36  ;;  %v1016_v35 = vsel %vm689_vm13, 1.0, %v1167_v47 }
 0x1ec   : > { %817 = vadd.xlane.f32.xlu1 %v790_v43  ;;  %v736_v59 = vmul.f32 %v1015_v62, %v637_v25  ;;  %v788_v61 = vmul.f32 %v1471_v42, %v1471_v42  ;;  %vm692_vm0 = vcmp.lt.s32.totalorder %v676_v26, 240 }
 0x1ed   : > { %v749_v51 = vmul.f32 %v733_v24, %v733_v24  ;;  %v763_v52 = vadd.f32 %v762_v49, %v748_v48  ;;  %v734_v54 = vmul.f32 %v1013_v1, %v635_v50  ;;  %v1104_v56 = vpop.f32.mrb[12].mxu1  ;;  %v751_v1 = vmul.f32 %v735_v21, %v735_v21 }
 0x1ee   : > { %v1486_v57 = vadd.f32 %v1104_v56, %v1356_v44  ;;  %v611_v22 = vpop.f32.mrb[13].mxu1  ;;  %v752_v9 = vmul.f32 %v736_v59, %v736_v59  ;;  %v1019_v18 = vsel %vm692_vm0, 1.0, %v1167_v47 }
 0x1ef   : > { %v764_v19 = vadd.f32 %v763_v52, %v749_v51  ;;  %v750_v30 = vmul.f32 %v734_v54, %v734_v54  ;;  %v1493_v15 = vadd.f32 %v1356_v44, %v611_v22  ;;  %v1105_v63 = vpop.f32.mrb[14].mxu1  ;;  %811 = vadd.xlane.f32.xlu0 %v787_v58 }
 0x1f0   : > { %v640_v62 = vsub.f32 %v1486_v57, %v1311_v31  ;;  %v1498_v3 = vadd.f32 %v1105_v63, %v1356_v44  ;;  %v614_v7 = vpop.f32.mrb[15].mxu1  ;;  %813 = vadd.xlane.f32.xlu1 %v788_v61  ;;  %v1018_v31 = vsel %vm691_vm14, 1.0, %v1167_v47  ;;  %v793_v2 = vmul.f32 %v1486_v57, %v1486_v57 }
 0x1f1   : > { %v765_v20 = vadd.f32 %v764_v19, %v750_v30  ;;  %v638_v13 = vsub.f32 %v1493_v15, %v1301_v27  ;;  %v1503_v8 = vadd.f32 %v1356_v44, %v614_v7  ;;  %v791_v10 = vmul.f32 %v1493_v15, %v1493_v15 }
 0x1f2   : > { %v641_v4 = vsub.f32 %v1498_v3, %v1314_v32  ;;  %v739_v29 = vmul.f32 %v1018_v31, %v640_v62  ;;  %v794_v23 = vmul.f32 %v1498_v3, %v1498_v3 }
 0x1f3   : > { %v766_v17 = vadd.f32 %v765_v20, %v751_v1  ;;  %v737_v14 = vmul.f32 %v1016_v35, %v638_v13  ;;  %v639_v27 = vsub.f32 %v1503_v8, %v1304_v28  ;;  %819 = vadd.xlane.f32.xlu0 %v791_v10  ;;  %v792_v44 = vmul.f32 %v1503_v8, %v1503_v8 }
 0x1f4   : > { %v740_v38 = vmul.f32 %v1019_v18, %v641_v4  ;;  %v755_v39 = vmul.f32 %v739_v29, %v739_v29 }
 0x1f5   : > { %v753_v33 = vmul.f32 %v737_v14, %v737_v14  ;;  %v767_v32 = vadd.f32 %v766_v17, %v752_v9  ;;  %v738_v34 = vmul.f32 %v1017_v12, %v639_v27  ;;  %821 = vadd.xlane.f32.xlu1 %v792_v44 }
 0x1f6   : > { %v756_v47 = vmul.f32 %v740_v38, %v740_v38 }
 0x1f7   : > { %v768_v36 = vadd.f32 %v767_v32, %v753_v33  ;;  %v754_v28 = vmul.f32 %v738_v34, %v738_v34  ;;  %823 = vadd.xlane.f32.xlu0 %v793_v2 }
 0x1f9   : > { %v769_v40 = vadd.f32 %v768_v36, %v754_v28  ;;  %825 = vadd.xlane.f32.xlu1 %v794_v23 }
 0x1fb   : > { %v770_v25 = vadd.f32 %v769_v40, %v755_v39 }
 0x1fd   : > { %v771_v43 = vadd.f32 %v770_v25, %v756_v47 }
 0x1ff   : > { %v772_v46 = vrot.slane %v771_v43, 4 }
 0x201   : > { %v773_v48 = vadd.f32 %v772_v46, %v771_v43 }
 0x203   : > { %v774_v49 = vrot.slane %v773_v48, 2 }
 0x205   : > { %v775_v24 = vadd.f32 %v774_v49, %v773_v48 }
 0x207   : > { %v776_v50 = vrot.slane %v775_v24, 1 }
 0x209   : > { %v777_v21 = vadd.f32 %v776_v50, %v775_v24 }
 0x20b   : > { %778 = vst [vmem:[%s263_s15] sm:$0x1] %v777_v21 }
 0x267   : > { %v800_v26 = vpop.xlane.xlu1 %799 }
 0x268   : > { %v829_v51 = vmax.f32 %v800_v26, 1e-24  ;;  %v796_v52 = vpop.xlane.xlu0 %795 }
 0x269   : > { %v827_v54 = vmax.f32 %v796_v52, 1e-24 }
 0x26a   : > { %1127 = vrsqrt.f32 %v829_v51 }
 0x26b   : > { %1129 = vrsqrt.f32 %v827_v54  ;;  %v802_v56 = vpop.xlane.xlu1 %801 }
 0x26c   : > { %v830_v58 = vmax.f32 %v802_v56, 1e-24  ;;  %v798_v59 = vpop.xlane.xlu0 %797 }
 0x26d   : > { %v828_v22 = vmax.f32 %v798_v59, 1e-24 }
 0x26e   : > { %1131 = vrsqrt.f32 %v830_v58 }
 0x26f   : > { %1133 = vrsqrt.f32 %v828_v22 }
 0x270   : > { %v808_v35 = vpop.xlane.xlu0 %807 }
 0x271   : > { %v833_v61 = vmax.f32 %v808_v35, 1e-24  ;;  %v810_v19 = vpop.xlane.xlu1 %809 }
 0x272   : > { %v834_v30 = vmax.f32 %v810_v19, 1e-24 }
 0x273   : > { %1135 = vrsqrt.f32 %v833_v61 }
 0x274   : > { %v1128_v63 = vpop.eup %1127  ;;  %1137 = vrsqrt.f32 %v834_v30  ;;  %v804_v1 = vpop.xlane.xlu0 %803 }
 0x275   : > { %v1130_v62 = vpop.eup %1129  ;;  %v861_v7 = vmul.f32 %v1128_v63, %v1367_v55  ;;  %v831_v20 = vmax.f32 %v804_v1, 1e-24  ;;  %v806_v13 = vpop.xlane.xlu1 %805 }
 0x276   : > { %v859_v10 = vmul.f32 %v1130_v62, %v1373_v60  ;;  %v832_v9 = vmax.f32 %v806_v13, 1e-24 }
 0x277   : > { %877 = vst [vmem:[%s1533_s17 + $0x10] sm:$0xff] %v861_v7  ;;  %1139 = vrsqrt.f32 %v831_v20 }
 0x278   : > { %v1132_v31 = vpop.eup %1131  ;;  %875 = vst [vmem:[%s1533_s17] sm:$0xff] %v859_v10  ;;  %1141 = vrsqrt.f32 %v832_v9  ;;  %v816_v4 = vpop.xlane.xlu0 %815 }
 0x279   : > { %v1134_v12 = vpop.eup %1133  ;;  %v862_v17 = vmul.f32 %v1132_v31, %v1379_v0  ;;  %v837_v14 = vmax.f32 %v816_v4, 1e-24  ;;  %v818_v27 = vpop.xlane.xlu1 %817 }
 0x27a   : > { %v860_v55 = vmul.f32 %v1134_v12, %v1386_v6  ;;  %v838_v44 = vmax.f32 %v818_v27, 1e-24 }
 0x27b   : > { %878 = vst [vmem:[%s1533_s17 + $0x18] sm:$0xff] %v862_v17  ;;  %1143 = vrsqrt.f32 %v837_v14 }
 0x27c   : > { %876 = vst [vmem:[%s1533_s17 + $0x8] sm:$0xff] %v860_v55  ;;  %1145 = vrsqrt.f32 %v838_v44  ;;  %v812_v60 = vpop.xlane.xlu0 %811 }
 0x27d   : > { %v1136_v18 = vpop.eup %1135  ;;  %v835_v2 = vmax.f32 %v812_v60, 1e-24  ;;  %v814_v29 = vpop.xlane.xlu1 %813 }
 0x27e   : > { %v1138_v33 = vpop.eup %1137  ;;  %v865_v32 = vmul.f32 %v1136_v18, %v1414_v37  ;;  %v836_v0 = vmax.f32 %v814_v29, 1e-24 }
 0x27f   : > { %v866_v34 = vmul.f32 %v1138_v33, %v1420_v45  ;;  %1147 = vrsqrt.f32 %v835_v2 }
 0x280   : > { %881 = vst [vmem:[%s1533_s17 + $0x30] sm:$0xff] %v865_v32  ;;  %1149 = vrsqrt.f32 %v836_v0  ;;  %v820_v6 = vpop.xlane.xlu0 %819 }
 0x281   : > { %v1140_v36 = vpop.eup %1139  ;;  %882 = vst [vmem:[%s1533_s17 + $0x38] sm:$0xff] %v866_v34  ;;  %v839_v38 = vmax.f32 %v820_v6, 1e-24 }
 0x282   : > { %v1142_v28 = vpop.eup %1141  ;;  %v863_v23 = vmul.f32 %v1140_v36, %v1417_v41  ;;  %v822_v39 = vpop.xlane.xlu1 %821 }
 0x283   : > { %v864_v40 = vmul.f32 %v1142_v28, %v1430_v53  ;;  %1151 = vrsqrt.f32 %v839_v38  ;;  %v840_v37 = vmax.f32 %v822_v39, 1e-24 }
 0x284   : > { %879 = vst [vmem:[%s1533_s17 + $0x20] sm:$0xff] %v863_v23  ;;  %v824_v45 = vpop.xlane.xlu0 %823 }
 0x285   : > { %v1144_v47 = vpop.eup %1143  ;;  %880 = vst [vmem:[%s1533_s17 + $0x28] sm:$0xff] %v864_v40  ;;  %1153 = vrsqrt.f32 %v840_v37  ;;  %v841_v25 = vmax.f32 %v824_v45, 1e-24 }
 0x286   : > { %v1146_v43 = vpop.eup %1145  ;;  %v869_v46 = vmul.f32 %v1144_v47, %v1451_v16  ;;  %v826_v48 = vpop.xlane.xlu1 %825 }
 0x287   : > { %v870_v41 = vmul.f32 %v1146_v43, %v1463_v5  ;;  %1155 = vrsqrt.f32 %v841_v25  ;;  %v842_v53 = vmax.f32 %v826_v48, 1e-24 }
 0x288   : > { %885 = vst [vmem:[%s1533_s17 + $0x50] sm:$0xff] %v869_v46 }
 0x289   : > { %v1148_v49 = vpop.eup %1147  ;;  %886 = vst [vmem:[%s1533_s17 + $0x58] sm:$0xff] %v870_v41  ;;  %1157 = vrsqrt.f32 %v842_v53 }
 0x28a   : > { %v1150_v24 = vpop.eup %1149  ;;  %v867_v50 = vmul.f32 %v1148_v49, %v1458_v11 }
 0x28b   : > { %v868_v21 = vmul.f32 %v1150_v24, %v1471_v42 }
 0x28c   : > { %883 = vst [vmem:[%s1533_s17 + $0x40] sm:$0xff] %v867_v50 }
 0x28d   : > { %v1152_v16 = vpop.eup %1151  ;;  %884 = vst [vmem:[%s1533_s17 + $0x48] sm:$0xff] %v868_v21 }
 0x28e   : > { %v871_v26 = vmul.f32 %v1152_v16, %v1493_v15 }
 0x28f   : > { %v1154_v5 = vpop.eup %1153 }
 0x290   : > { %887 = vst [vmem:[%s1533_s17 + $0x60] sm:$0xff] %v871_v26  ;;  %v872_v51 = vmul.f32 %v1154_v5, %v1503_v8 }
 0x291   : > { %v1156_v52 = vpop.eup %1155 }
 0x292   : > { %888 = vst [vmem:[%s1533_s17 + $0x68] sm:$0xff] %v872_v51  ;;  %v873_v54 = vmul.f32 %v1156_v52, %v1486_v57 }
 0x293   : > { %v1158_v56 = vpop.eup %1157 }
 0x294   : > { %889 = vst [vmem:[%s1533_s17 + $0x70] sm:$0xff] %v873_v54  ;;  %v874_v58 = vmul.f32 %v1158_v56, %v1498_v3 }
 0x296   : > { %890 = vst [vmem:[%s1533_s17 + $0x78] sm:$0xff] %v874_v58 }
 0x297 PF: > { %s17_s21 = sadd.s32 1, %s1165_s21  }
 0x298   : > { %p14_p5 = scmp.ge.s32.totalorder %s17_s21, 4  }
 0x29a   :  { %16 = sbr.rel (!%p14_p5) target bundleno = 1 (0x1), region = 82 }

// kernel: lightgcn_forward.13
= control target key start
LH: loop header
LB: loop body
LE: loop exit
PB: predicated region body
PF: predicated region fallthrough
CT: control target
= control target key end

     0   :  { %8 = vsyncpa [#allocation4], 0  ;;  %s785_s0 = inlined_call_operand.vmem [shape: bf16[8,128], index: 0, kind: input, shape index: {}]   ;;  %s786_s1 = inlined_call_operand.vmem [shape: f32[8,1], index: 1, kind: input, shape index: {}]   ;;  %s787_s2 = inlined_call_operand.vmem [shape: bf16[128,256], index: 2, kind: input, shape index: {}]   ;;  %s788_s3 = inlined_call_operand.hbm [shape: f32[8,256], index: 3, kind: output, shape index: {}]  }
   0x1   :  { %10 = vsyncpa [#allocation4 + $0x1], 0  ;;  %s651_s12 = smov 0   ;;  %s653_s13 = smov 0  }
   0x2   :  { %s655_s14 = smov 0   ;;  %s657_s15 = smov 0  }
   0x3 LB: > { %s462_s16 = sadd.s32 4294967295, %s625_s15   ;;  %s463_s17 = sadd.s32 4294967294, %s625_s15   ;;  %s625_s15 = sphi %s657_s15, %s794_s15   ;;  %s621_s14 = sphi %s655_s14, %s793_s14   ;;  %s617_s13 = sphi %s653_s13, %s792_s13   ;;  %s613_s12 = sphi %s651_s12, %s791_s12  }
   0x4   : > { %s674_s18 = sadd.s32 1, %s625_s15   ;;  %s65_s19 = sadd.s32 1, %s621_s14 }
   0x5   : > { %s62_s20 = ssub.s32 %s625_s15, %s674_s18  ;;  %p72_p0 = scmp.ne.s32.totalorder %s621_s14, %s617_s13 }
   0x6   : > { %p63_p1 = scmp.eq.s32.totalorder %s62_s20, 0  ;;  %p73_p2 = scmp.eq.s32.totalorder %s625_s15, 0 }
   0x7   : > { %p102_p3 = scmp.eq.s32.totalorder %s462_s16, 1  ;;  %p107_p4 = scmp.ne.s32.totalorder %s617_s13, %s613_s12 }
   0x8   : > { %s687_s21 = scalar_select %p63_p1, %s621_s14, %s65_s19  }
   0x9   : > { %p74_p5 = por %p73_p2, %p72_p0  ;;  %p689_p6 = por %p102_p3, %p72_p0 }
   0xa   : > { %p108_p7 = scmp.eq.s32.totalorder %s463_s17, 1  ;;  %p465_p9 = scmp.ge.s32.totalorder %s625_s15, 2 }
   0xc   : > { %p693_p8 = por %p108_p7, %p107_p4  ;;  %130 = sbr.rel (%p465_p9) target bundleno = 33 (0x21), region = 24 }
  0x13   : > { %133 = sbr.rel (!%p74_p5) target bundleno = 33 (0x21), region = 28  ;;  %s135_s24 = sand.u32 (%p74_p5), 1, %s621_s14  }
  0x14   : > { %s467_s25 = sshll.u32 (%p74_p5), %s625_s15, 2  ;;  %s466_s26 = sshll.u32 (%p74_p5), %s135_s24, 6 }
  0x15   : > { %s705_s29 = scalar_lea.vmem (%p74_p5), %s787_s2, %s467_s25  ;;  %s137_s30 = scalar_lea.vmem (%p74_p5), [#allocation2], %s466_s26 }
  0x16   : > { %v155_v0 = vld [vmem:[%s705_s29] sm:$0xf] (%p74_p5)  ;;  %v157_v1 = vld [vmem:[%s705_s29 + $0x8] sm:$0xf] (%p74_p5)  ;;  %v159_v2 = vld [vmem:[%s705_s29 + $0x10] sm:$0xf] (%p74_p5) }
  0x17   : > { %156 = vst [vmem:[%s137_s30] sm:$0xf] (%p74_p5), %v155_v0  ;;  %158 = vst [vmem:[%s137_s30 + $0x4] sm:$0xf] (%p74_p5), %v157_v1  ;;  %v161_v3 = vld [vmem:[%s705_s29 + $0x18] sm:$0xf] (%p74_p5) }
  0x18   : > { %v163_v4 = vld [vmem:[%s705_s29 + $0x20] sm:$0xf] (%p74_p5)  ;;  %160 = vst [vmem:[%s137_s30 + $0x8] sm:$0xf] (%p74_p5), %v159_v2  ;;  %162 = vst [vmem:[%s137_s30 + $0xc] sm:$0xf] (%p74_p5), %v161_v3 }
  0x19   : > { %164 = vst [vmem:[%s137_s30 + $0x10] sm:$0xf] (%p74_p5), %v163_v4  ;;  %v165_v5 = vld [vmem:[%s705_s29 + $0x28] sm:$0xf] (%p74_p5)  ;;  %v167_v6 = vld [vmem:[%s705_s29 + $0x30] sm:$0xf] (%p74_p5) }
  0x1a   : > { %v169_v7 = vld [vmem:[%s705_s29 + $0x38] sm:$0xf]  ;;  %166 = vst [vmem:[%s137_s30 + $0x14] sm:$0xf] %v165_v5  ;;  %168 = vst [vmem:[%s137_s30 + $0x18] sm:$0xf] %v167_v6 }
  0x1b   : > { %170 = vst [vmem:[%s137_s30 + $0x1c] sm:$0xf] %v169_v7  ;;  %v171_v8 = vld [vmem:[%s705_s29 + $0x40] sm:$0xf]  ;;  %v173_v9 = vld [vmem:[%s705_s29 + $0x48] sm:$0xf] }
  0x1c   : > { %v175_v10 = vld [vmem:[%s705_s29 + $0x50] sm:$0xf]  ;;  %172 = vst [vmem:[%s137_s30 + $0x20] sm:$0xf] %v171_v8  ;;  %174 = vst [vmem:[%s137_s30 + $0x24] sm:$0xf] %v173_v9 }
  0x1d   : > { %176 = vst [vmem:[%s137_s30 + $0x28] sm:$0xf] %v175_v10  ;;  %v177_v11 = vld [vmem:[%s705_s29 + $0x58] sm:$0xf]  ;;  %v179_v12 = vld [vmem:[%s705_s29 + $0x60] sm:$0xf] }
  0x1e   : > { %v181_v13 = vld [vmem:[%s705_s29 + $0x68] sm:$0xf]  ;;  %178 = vst [vmem:[%s137_s30 + $0x2c] sm:$0xf] %v177_v11  ;;  %180 = vst [vmem:[%s137_s30 + $0x30] sm:$0xf] %v179_v12 }
  0x1f   : > { %182 = vst [vmem:[%s137_s30 + $0x34] sm:$0xf] %v181_v13  ;;  %v183_v14 = vld [vmem:[%s705_s29 + $0x70] sm:$0xf]  ;;  %v185_v15 = vld [vmem:[%s705_s29 + $0x78] sm:$0xf] }
  0x20   : > { %184 = vst [vmem:[%s137_s30 + $0x38] sm:$0xf] %v183_v14  ;;  %186 = vst [vmem:[%s137_s30 + $0x3c] sm:$0xf] %v185_v15 }
  0x21 PF: > { %p468_p10 = scmp.ge.s32.totalorder %s625_s15, 1  ;;  %p240_p11 = scmp.lt.s32.totalorder %s625_s15, 3 }
  0x23   : > { %p241_p12 = pnand %p468_p10, %p240_p11 }
  0x24   : > { %s726_s4 = sand.u32 (!%p241_p12), 1, %s617_s13   ;;  %v627_v16 = vmov (!%p241_p12), 0.0   ;;  %vm628_vm0 = vmmov (!%p241_p12), 0   ;;  %v376_v17 = vld [vmem:[%s786_s1] sm:$0xff] (!%p241_p12)  ;;  %v629_v18 = vmov (!%p241_p12), 0   ;;  %s480_s17 = sshll.u32 (!%p241_p12), %s462_s16, 7 }
  0x25   : > { %244 = sbr.rel (%p241_p12) target bundleno = 299 (0x12b), region = 69  ;;  %492 = vmatprep.subr.bf16.mxu0 (!%p241_p12), %v627_v16  ;;  %s469_s5 = sshll.u32 (!%p241_p12), %s726_s4, 6  ;;  %508 = vmatprep.mubr.msk.bf16.mxu0 (!%p241_p12), %vm628_vm0, %v627_v16  ;;  %v271_v27 = vld [vmem:[%s785_s0] sm:$0xf] (!%p241_p12) }
  0x26   : > { %554 = vset.pattern.permute.xlu0 (!%p241_p12), %v629_v18  ;;  %s249_s8 = scalar_lea.vmem (!%p241_p12), [#allocation2], %s469_s5  ;;  %s470_s11 = sshll.u32 (!%p241_p12), %s726_s4, 3 }
  0x27   : > { %v555_v19 = vld [vmem:[%s249_s8] sm:$0xff] (!%p241_p12)   ;;  %379 = vperm.xlu0 (!%p241_p12), %554, %v376_v17   ;;  %v556_v20 = vld [vmem:[%s249_s8 + $0x8] sm:$0xff] (!%p241_p12)   ;;  %v557_v21 = vld [vmem:[%s249_s8 + $0x10] sm:$0xff] (!%p241_p12)   ;;  %s269_s19 = scalar_lea.vmem (!%p241_p12), [#allocation3], %s470_s11  ;;  %s741_s26 = scalar_lea.hbm (!%p241_p12), %s788_s3, %s480_s17 }
  0x28   : > { %493 = vmatpush3.bf16.msra.mxu0 (!%p241_p12), %v555_v19  ;;  %v558_v22 = vld [vmem:[%s249_s8 + $0x18] sm:$0xff] (!%p241_p12)   ;;  %v559_v23 = vld [vmem:[%s249_s8 + $0x20] sm:$0xff] (!%p241_p12)   ;;  %v560_v24 = vld [vmem:[%s249_s8 + $0x28] sm:$0xff] (!%p241_p12)   ;;  %s398_s20 = sshll.u32 (!%p241_p12), %s269_s19, 4  ;;  %s385_s27 = scalar_lea.sflag (!%p241_p12), [#allocation4], %s726_s4  ;;  %s743_s20 = int_to_ptr.vmem [resolvable:$true] %s398_s20 }
  0x29   : > { %494 = vmatprep.subr.bf16.mxu0 (!%p241_p12), %v627_v16  ;;  %v561_v25 = vld [vmem:[%s249_s8 + $0x30] sm:$0xff] (!%p241_p12)   ;;  %v562_v26 = vld [vmem:[%s249_s8 + $0x38] sm:$0xff] (!%p241_p12)   ;;  %s563_s16 = scalar_lea.vmem (!%p241_p12), %s743_s20, 128  ;;  %s630_s28 = smov (!%p241_p12), [#allocation3]  }
  0x2a   : > { %p564_p13 = scmp.ne.s32.totalorder (!%p241_p12), %s743_s20, %s563_s16  ;;  %s567_s29 = sshll.u32 (!%p241_p12), %s630_s28, 4  ;;  %s568_s29 = int_to_ptr.vmem [resolvable:$false] %s567_s29 }
  0x2b   : > { %s569_s30 = scalar_lea.vmem (!%p241_p12), %s568_s29, 256  ;;  %p570_p2 = scmp.lt.s32.totalorder (!%p241_p12), %s743_s20, %s568_s29 }
  0x2c   : > { %495 = vmatpush3.bf16.msra.mxu0 %v556_v20  ;;  %p565_p0 = pnand %p564_p13, %p689_p6  ;;  %p571_p3 = scmp.lt.s32.totalorder %s569_s30, %s563_s16 }
  0x2d   : > { %496 = vmatprep.subr.bf16.mxu0 %v627_v16 }
  0x2e   : > { %p566_p1 = pneg %p565_p0  ;;  %p572_p4 = por %p571_p3, %p570_p2 }
  0x30   : > { %497 = vmatpush3.bf16.msra.mxu0 %v557_v21  ;;  %p573_p5 = pnand %p572_p4, %p566_p1 }
  0x31   : > { %498 = vmatprep.subr.bf16.mxu0 %v627_v16 }
  0x34   : > { %499 = vmatpush3.bf16.msra.mxu0 %v558_v22 }
  0x35   : > { %500 = vmatprep.subr.bf16.mxu0 %v627_v16 }
  0x38   : > { %501 = vmatpush3.bf16.msra.mxu0 %v559_v23 }
  0x39   : > { %502 = vmatprep.subr.bf16.mxu0 %v627_v16 }
  0x3c   : > { %503 = vmatpush3.bf16.msra.mxu0 %v560_v24 }
  0x3d   : > { %504 = vmatprep.subr.bf16.mxu0 %v627_v16 }
  0x40   : > { %505 = vmatpush3.bf16.msra.mxu0 %v561_v25 }
  0x41   : > { %506 = vmatprep.subr.bf16.mxu0 %v627_v16 }
  0x44   : > { %507 = vmatpush3.bf16.msra.mxu0 %v562_v26 }
  0x47   : > { %509 = vmatmul.mubr.bf16.vlgmr.msra.gmra.mrb[0].mxu0 %v271_v27 }
  0xa6   : > { %v380_v28 = vpop.permute.xlu0 %379 }
 0x11a   : > { %v370_v29 = vpop.f32.mrb[0].mxu0 }
 0x11b   : > { %v382_v30 = vsub.f32 %v370_v29, %v380_v28  ;;  %v510_v31 = vpop.f32.mrb[1].mxu0 }
 0x11c   : > { %v373_v32 = vpop.f32.mrb[2].mxu0 }
 0x11d   : > { %383 = vst [vmem:[%s269_s19] sm:$0xff] %v382_v30  ;;  %v511_v33 = vpop.f32.mrb[3].mxu0 }
 0x11e   : > { %576 = shalt.err (!%p573_p5)
}
 0x11f   : > { %s577_s4 = scalar_lea.hbm %s741_s26, 128  ;;  %s581_s7 = scalar_lea.hbm %s788_s3, 256 }
 0x120   : > { %p578_p7 = scmp.ne.s32.totalorder %s741_s26, %s577_s4  ;;  %p582_p12 = scmp.lt.u32.totalorder %s741_s26, %s788_s3 }
 0x121   : > { %p583_p13 = scmp.lt.u32.totalorder %s581_s7, %s577_s4  ;;  %p585_p1 = scmp.lt.u32.totalorder %s577_s4, %s741_s26 }
 0x122   : > { %p579_p10 = pnand %p578_p7, %p689_p6 }
 0x123   : > { %p584_p0 = por %p583_p13, %p582_p12 }
 0x124   : > { %p580_p11 = pneg %p579_p10 }
 0x125   : > { %p586_p2 = por %p585_p1, %p584_p0 }
 0x127   : > { %p587_p3 = pnand %p586_p2, %p580_p11 }
 0x129   : > { %590 = shalt.err (!%p587_p3)
}
 0x12a   : > { %512 = dma.vmem_to_hbm [thread:$0]  (%p689_p6), %s743_s20, 128, %s741_s26, %s385_s27  }
 0x12b PF: > { %s410_s10 = sand.u32 1, %s613_s12   ;;  %p515_p4 = pnand %p465_p9, %p693_p8 }
 0x12c   : > { %s411_s11 = scalar_lea.sflag [#allocation4], %s410_s10 }
 0x12d   : > { %608 = dma.done.wait (!%p515_p4), %s411_s11, 128  }
 0x12e   : > { %610 = vsyncadd (!%p515_p4), %s411_s11, 4294967168  ;;  %p13_p5 = scmp.ge.s32.totalorder %s674_s18, 4   ;;  %s791_s12 = smov %s617_s13 }
 0x12f   : > { %s792_s13 = smov %s621_s14  ;;  %s793_s14 = smov %s687_s21 }
 0x130   : > { %s794_s15 = smov %s674_s18  ;;  %15 = sbr.rel (!%p13_p5) target bundleno = 3 (0x3), region = 113 }
 0x137   :  { %416 = vsyncpa [#allocation4], 1 }
 0x138   :  { %418 = vsyncpa [#allocation4 + $0x1], 1 }

</bundles_post_ra>
